<compile_context>
chip_gen: v7x
topology: tpu7x:2x2x1
jax: 0.10.0
libtpu: 0.0.40
codegen_flags: <defaults>
</compile_context>

<pallas_src>
import functools

import jax
import jax.numpy as jnp
import numpy as np
from jax.experimental import pallas as pl
from jax.experimental.pallas import tpu as pltpu

_GN_EPS = 1e-5
_VMEM_LIMIT = 32 * 1024 * 1024


# ------------------------------------------------------------------------------------
# Shared in-kernel GroupNorm helper (per-channel norm over the lane (H*W) axis).
# ------------------------------------------------------------------------------------
def _gn(x, g, b, eps):
    mu = jnp.mean(x, axis=-1, keepdims=True)
    xc = x - mu
    var = jnp.mean(xc * xc, axis=-1, keepdims=True)
    return xc * jax.lax.rsqrt(var + eps) * g + b


# ------------------------------------------------------------------------------------
# Pallas kernel 1: conv branches as one lane-dense MXU matmul per branch.
#   (Cout, CC) @ (CC, B*HW) -> (Cout, B*HW), then static per-batch lane-slice stores
#   into a (B, Cout, HW) layout output (no layout transposes downstream).
# ------------------------------------------------------------------------------------
def _conv_branch_kernel(col_ref, w_ref, o_ref, *, batch, hw):
    acc = jnp.dot(w_ref[0], col_ref[0], preferred_element_type=jnp.float32)  # (Cout, B*HW)
    for b in range(batch):  # static; each slice starts at a multiple of 128 lanes
        o_ref[0, b, :, :] = acc[:, b * hw:(b + 1) * hw].astype(o_ref.dtype)


def pallas_conv_branches(cols, w2, *, batch, hw, matmul_dtype=jnp.float32):
    """cols: (n_br, CC, B*HW); w2: (n_br, Cout, CC) -> (n_br, B, Cout, HW) float32."""
    n_br, CC, BHW = cols.shape
    Cout = w2.shape[1]
    assert BHW == batch * hw and hw % 128 == 0, "lane axis must stay 128-dense"
    if matmul_dtype != jnp.float32:  # optional bf16 MXU path (accuracy trade-off)
        cols = cols.astype(matmul_dtype)
        w2 = w2.astype(matmul_dtype)
    kern = functools.partial(_conv_branch_kernel, batch=batch, hw=hw)
    flops = 2 * n_br * Cout * CC * BHW
    bytes_accessed = (cols.size * cols.dtype.itemsize + w2.size * w2.dtype.itemsize
                      + n_br * batch * Cout * hw * 4)
    return pl.pallas_call(
        kern,
        out_shape=jax.ShapeDtypeStruct((n_br, batch, Cout, hw), jnp.float32),
        grid=(n_br,),
        in_specs=[
            pl.BlockSpec((1, CC, BHW), lambda br: (br, 0, 0)),
            pl.BlockSpec((1, Cout, CC), lambda br: (br, 0, 0)),
        ],
        out_specs=pl.BlockSpec((1, batch, Cout, hw), lambda br: (br, 0, 0, 0)),
        compiler_params=pltpu.CompilerParams(
            dimension_semantics=("parallel",),
            vmem_limit_bytes=_VMEM_LIMIT),
        cost_estimate=pl.CostEstimate(flops=flops, transcendentals=0,
                                      bytes_accessed=bytes_accessed),
    )(cols, w2)


# ------------------------------------------------------------------------------------
# Pallas kernel 2 (Conv2dFT epilogue): fused (img+ft) add + GroupNorm + GroupNorm
# + add + ReLU, channel-tiled grid (B, C/C_tile), lane-dense (C_tile, HW) blocks.
# ------------------------------------------------------------------------------------
def _gn4_add_relu_kernel(a1_ref, a2_ref, b1_ref, b2_ref,
                         ga_ref, ba_ref, gb_ref, bb_ref, o_ref, *, eps):
    a = _gn(a1_ref[0].astype(jnp.float32) + a2_ref[0].astype(jnp.float32),
            ga_ref[...], ba_ref[...], eps)
    b = _gn(b1_ref[0].astype(jnp.float32) + b2_ref[0].astype(jnp.float32),
            gb_ref[...], bb_ref[...], eps)
    o_ref[0] = jnp.maximum(a + b, 0.0).astype(o_ref.dtype)


def pallas_gn4_add_relu(a1, a2, b1, b2, gn_a, gn_b, *, eps=_GN_EPS):
    """ReLU( GN(a1+a2) + GN(b1+b2) ); a*,b*: (B, C, HW); gn_* = (gamma, beta) each (C,)."""
    B, C, HW = a1.shape
    assert HW % 128 == 0
    ct = C if C <= 128 else 128
    assert C % ct == 0
    ga, ba = gn_a
    gb, bb = gn_b
    kern = functools.partial(_gn4_add_relu_kernel, eps=eps)
    dat_spec = pl.BlockSpec((1, ct, HW), lambda b, c: (b, c, 0))
    par_spec = pl.BlockSpec((ct, 1), lambda b, c: (c, 0))
    bytes_accessed = 4 * (5 * B * C * HW + 4 * C)
    return pl.pallas_call(
        kern,
        out_shape=jax.ShapeDtypeStruct((B, C, HW), jnp.float32),
        grid=(B, C // ct),
        in_specs=[dat_spec, dat_spec, dat_spec, dat_spec,
                  par_spec, par_spec, par_spec, par_spec],
        out_specs=dat_spec,
        compiler_params=pltpu.CompilerParams(
            dimension_semantics=("parallel", "parallel"),
            vmem_limit_bytes=_VMEM_LIMIT),
        cost_estimate=pl.CostEstimate(flops=10 * B * C * HW, transcendentals=2 * B * C,
                                      bytes_accessed=bytes_accessed),
    )(a1, a2, b1, b2,
      ga.reshape(C, 1), ba.reshape(C, 1), gb.reshape(C, 1), bb.reshape(C, 1))


# ------------------------------------------------------------------------------------
# Pallas kernel 3 (flag_convFT=False path): the WHOLE cell in one pallas_call —
# conv(i2h) + conv(h2h) + GN + GN + add + ReLU.  Conv biases dropped (GN cancels them).
# ------------------------------------------------------------------------------------
def _plain_cell_kernel(colx_ref, colh_ref, wi_ref, wh_ref,
                       gi_ref, bi_ref, gh_ref, bh_ref, o_ref, *, eps):
    a = jnp.dot(wi_ref[...], colx_ref[0], preferred_element_type=jnp.float32)  # (ct, HW)
    b = jnp.dot(wh_ref[...], colh_ref[0], preferred_element_type=jnp.float32)  # (ct, HW)
    a = _gn(a, gi_ref[...], bi_ref[...], eps)
    b = _gn(b, gh_ref[...], bh_ref[...], eps)
    o_ref[0] = jnp.maximum(a + b, 0.0).astype(o_ref.dtype)


def pallas_plain_cell(col_x, col_h, wi2, wh2, gn_i, gn_h, *, eps=_GN_EPS,
                      matmul_dtype=jnp.float32):
    """col_x: (B, CCi, HW); col_h: (B, CCh, HW); wi2: (C, CCi); wh2: (C, CCh)
    -> ReLU(GN(conv_i2h(x)) + GN(conv_h2h(h))) as (B, C, HW)."""
    B, CCi, HW = col_x.shape
    CCh = col_h.shape[1]
    C = wi2.shape[0]
    assert HW % 128 == 0
    ct = C if C <= 128 else 128
    assert C % ct == 0
    if matmul_dtype != jnp.float32:
        col_x, col_h = col_x.astype(matmul_dtype), col_h.astype(matmul_dtype)
        wi2, wh2 = wi2.astype(matmul_dtype), wh2.astype(matmul_dtype)
    gi, bi = gn_i
    gh, bh = gn_h
    kern = functools.partial(_plain_cell_kernel, eps=eps)
    par_spec = pl.BlockSpec((ct, 1), lambda b, c: (c, 0))
    flops = 2 * B * C * (CCi + CCh) * HW + 10 * B * C * HW
    bytes_accessed = (col_x.size * col_x.dtype.itemsize
                      + col_h.size * col_h.dtype.itemsize
                      + (wi2.size + wh2.size) * wi2.dtype.itemsize
                      + 4 * (B * C * HW + 4 * C))
    return pl.pallas_call(
        kern,
        out_shape=jax.ShapeDtypeStruct((B, C, HW), jnp.float32),
        grid=(B, C // ct),
        in_specs=[
            pl.BlockSpec((1, CCi, HW), lambda b, c: (b, 0, 0)),
            pl.BlockSpec((1, CCh, HW), lambda b, c: (b, 0, 0)),
            pl.BlockSpec((ct, CCi), lambda b, c: (c, 0)),
            pl.BlockSpec((ct, CCh), lambda b, c: (c, 0)),
            par_spec, par_spec, par_spec, par_spec,
        ],
        out_specs=pl.BlockSpec((1, ct, HW), lambda b, c: (b, c, 0)),
        compiler_params=pltpu.CompilerParams(
            dimension_semantics=("parallel", "parallel"),
            vmem_limit_bytes=_VMEM_LIMIT),
        cost_estimate=pl.CostEstimate(flops=flops, transcendentals=2 * B * C,
                                      bytes_accessed=bytes_accessed),
    )(col_x, col_h, wi2, wh2,
      gi.reshape(C, 1), bi.reshape(C, 1), gh.reshape(C, 1), bh.reshape(C, 1))


# ------------------------------------------------------------------------------------
# Wrapper-side layout plumbing (pure XLA; NCHW / (B, C, H*W) end-to-end).
# ------------------------------------------------------------------------------------
def _weight_matrix(w_oihw):
    """OIHW conv weight -> (Cout, K*K*Cin), tap order (kh, kw, cin)."""
    Cout, Cin, K, _ = w_oihw.shape
    return jnp.transpose(w_oihw, (0, 2, 3, 1)).reshape(Cout, K * K * Cin)


def _im2col_bm(xpad, K, H, W):
    """Padded (B, Cin, Hp, Wp) -> (B, K*K*Cin, H*W); tap order (kh, kw, cin)."""
    B, Cin = xpad.shape[0], xpad.shape[1]
    taps = [xpad[:, :, kh:kh + H, kw:kw + W] for kh in range(K) for kw in range(K)]
    col = jnp.stack(taps, axis=1)                 # (B, K*K, Cin, H, W)
    return col.reshape(B, K * K * Cin, H * W)


def _im2col_cm(xpad, K, H, W):
    """Padded (B, Cin, Hp, Wp) -> (K*K*Cin, B*H*W); tap (kh,kw,cin), lane order (b,h,w)."""
    B, Cin = xpad.shape[0], xpad.shape[1]
    taps = [xpad[:, :, kh:kh + H, kw:kw + W] for kh in range(K) for kw in range(K)]
    col = jnp.stack(taps, axis=0)                 # (K*K, B, Cin, H, W)
    col = jnp.transpose(col, (0, 2, 1, 3, 4))     # (K*K, Cin, B, H, W)
    return col.reshape(K * K * Cin, B * H * W)


def conv2dft_parts(x, params, *, kernel_size, matmul_dtype=jnp.float32):
    """Conv2dFT split into (image-domain, fourier-domain) parts; both conv branches run in
    ONE pallas_call (grid over branch).  The image-domain bias is dropped (the GroupNorm that
    follows in CRNNcell cancels a per-channel constant); the k-space bias is added before the
    IFFT where it does NOT reduce to a constant.  Returns hid_img, hid_ft each (B, Cout, HW)."""
    w_img, _b_img, w_ft, b_ft = params            # _b_img intentionally unused (GN cancels it)
    B, Cin, H, W = x.shape
    K = kernel_size
    p = K // 2
    Cout = w_img.shape[0]
    HW = H * W
    assert K % 2 == 1 and Cin % 2 == 0 and Cout % 2 == 0

    # ---- image-domain branch (zero 'same' pad) ----
    xp_img = jnp.pad(x, ((0, 0), (0, 0), (p, p), (p, p)))
    col_img = _im2col_cm(xp_img, K, H, W)                         # (CC, B*HW)

    # ---- fourier-domain branch (reflect pad, conv in k-space) ----
    # TODO(synk): FFT/IFFT/fftshift have no Pallas TPU equivalent; computed in plain JAX.
    xc = x[:, :Cin // 2] + 1j * x[:, Cin // 2:]
    ksp = jnp.fft.fftshift(jnp.fft.fft2(xc, axes=(2, 3)), axes=(2, 3))
    kspace = jnp.concatenate([ksp.real, ksp.imag], axis=1)        # (B, Cin, H, W)
    xp_ft = jnp.pad(kspace, ((0, 0), (0, 0), (p, p), (p, p)), mode="reflect")
    col_ft = _im2col_cm(xp_ft, K, H, W)                           # (CC, B*HW)

    cols = jnp.stack([col_img, col_ft], axis=0)                   # (2, CC, B*HW)
    w2 = jnp.stack([_weight_matrix(w_img), _weight_matrix(w_ft)], axis=0)
    out = pallas_conv_branches(cols, w2, batch=B, hw=HW,
                               matmul_dtype=matmul_dtype)         # (2, B, Cout, HW)

    hid_img = out[0]                                              # (B, Cout, HW)
    hk = out[1].reshape(B, Cout, H, W) + b_ft[None, :, None, None]
    hc = hk[:, :Cout // 2] + 1j * hk[:, Cout // 2:]
    hid_ft = jnp.fft.ifft2(jnp.fft.fftshift(hc, axes=(2, 3)), axes=(2, 3))
    hid_ft = jnp.concatenate([hid_ft.real, hid_ft.imag], axis=1).reshape(B, Cout, HW)
    return hid_img, hid_ft


def crnn_cell_forward(x, h, params, *, kernel_size, flag_convFT=False,
                      matmul_dtype=jnp.float32):
    """CRNNcell.forward with flag_bn=1, flag_hidden=1.
    x: (B, input_size, H, W); h: (B, hidden_size, H, W) -> (B, hidden_size, H, W)."""
    B, _, H, W = x.shape
    if flag_convFT:
        i2h_img, i2h_ft = conv2dft_parts(x, params["i2h"], kernel_size=kernel_size,
                                         matmul_dtype=matmul_dtype)
        h2h_img, h2h_ft = conv2dft_parts(h, params["h2h"], kernel_size=kernel_size,
                                         matmul_dtype=matmul_dtype)
        out_flat = pallas_gn4_add_relu(i2h_img, i2h_ft, h2h_img, h2h_ft,
                                       params["bn_i2h"], params["bn_h2h"])
    else:
        K = kernel_size
        p = K // 2
        wi, _bi = params["i2h"]      # biases dropped: exactly cancelled by GroupNorm
        wh, _bh = params["h2h"]
        col_x = _im2col_bm(jnp.pad(x, ((0, 0), (0, 0), (p, p), (p, p))), K, H, W)
        col_h = _im2col_bm(jnp.pad(h, ((0, 0), (0, 0), (p, p), (p, p))), K, H, W)
        out_flat = pallas_plain_cell(col_x, col_h, _weight_matrix(wi), _weight_matrix(wh),
                                     params["bn_i2h"], params["bn_h2h"],
                                     matmul_dtype=matmul_dtype)
    return out_flat.reshape(B, out_flat.shape[1], H, W)


# ------------------------------------------------------------------------------------
# Pure-JAX reference (no Pallas) for numerical validation.
# ------------------------------------------------------------------------------------
def _ref_conv(x, w, b, K, mode):
    p = K // 2
    if mode == "zeros":
        xp = jnp.pad(x, ((0, 0), (0, 0), (p, p), (p, p)))
    else:
        xp = jnp.pad(x, ((0, 0), (0, 0), (p, p), (p, p)), mode="reflect")
    y = jax.lax.conv_general_dilated(
        xp, w, (1, 1), "VALID",
        dimension_numbers=("NCHW", "OIHW", "NCHW"),
        precision=jax.lax.Precision.HIGHEST)
    return y + b[None, :, None, None]


def _ref_conv2dft(x, params, K):
    w_img, b_img, w_ft, b_ft = params
    B, Cin, H, W = x.shape
    Cout = w_img.shape[0]
    hid_img = _ref_conv(x, w_img, b_img, K, "zeros")
    xc = x[:, :Cin // 2] + 1j * x[:, Cin // 2:]
    ksp = jnp.fft.fftshift(jnp.fft.fft2(xc, axes=(2, 3)), axes=(2, 3))
    kspace = jnp.concatenate([ksp.real, ksp.imag], axis=1)
    hk = _ref_conv(kspace, w_ft, b_ft, K, "reflect")
    hc = hk[:, :Cout // 2] + 1j * hk[:, Cout // 2:]
    hid_ft = jnp.fft.ifft2(jnp.fft.fftshift(hc, axes=(2, 3)), axes=(2, 3))
    hid_ft = jnp.concatenate([hid_ft.real, hid_ft.imag], axis=1)
    return hid_img + hid_ft


def _ref_gn(x, g, b, eps=_GN_EPS):
    mu = jnp.mean(x, axis=(2, 3), keepdims=True)
    var = jnp.mean((x - mu) ** 2, axis=(2, 3), keepdims=True)
    return (x - mu) * jax.lax.rsqrt(var + eps) * g[None, :, None, None] + b[None, :, None, None]


def ref_crnn_cell(x, h, params, K, flag_convFT):
    if flag_convFT:
        i2h = _ref_conv2dft(x, params["i2h"], K)
        h2h = _ref_conv2dft(h, params["h2h"], K)
    else:
        i2h = _ref_conv(x, *params["i2h"], K, "zeros")
        h2h = _ref_conv(h, *params["h2h"], K, "zeros")
    i2h = _ref_gn(i2h, *params["bn_i2h"])
    h2h = _ref_gn(h2h, *params["bn_h2h"])
    return jnp.maximum(i2h + h2h, 0.0)


# ------------------------------------------------------------------------------------
if __name__ == "__main__":
    B, Cin, H, W = 2, 4, 16, 16
    hidden, K = 32, 3

    key = jax.random.PRNGKey(0)
    keys = jax.random.split(key, 14)
    x = jax.random.normal(keys[0], (B, Cin, H, W), jnp.float32)
    h = jax.random.normal(keys[1], (B, hidden, H, W), jnp.float32)

    def conv_params(kw, kb, cin, cout):
        bound = 1.0 / np.sqrt(cin * K * K)
        w = jax.random.uniform(kw, (cout, cin, K, K), jnp.float32, -bound, bound)
        b = jax.random.uniform(kb, (cout,), jnp.float32, -bound, bound)
        return w, b

    # Conv2dFT(i2h): image-domain + fourier-domain convs; same for h2h.
    w_i_img, b_i_img = conv_params(keys[2], keys[3], Cin, hidden)
    w_i_ft, b_i_ft = conv_params(keys[4], keys[5], Cin, hidden)
    w_h_img, b_h_img = conv_params(keys[6], keys[7], hidden, hidden)
    w_h_ft, b_h_ft = conv_params(keys[8], keys[9], hidden, hidden)
    gn_i = (1.0 + 0.1 * jax.random.normal(keys[10], (hidden,), jnp.float32),
            0.1 * jax.random.normal(keys[11], (hidden,), jnp.float32))
    gn_h = (1.0 + 0.1 * jax.random.normal(keys[12], (hidden,), jnp.float32),
            0.1 * jax.random.normal(keys[13], (hidden,), jnp.float32))

    params_ft = {"i2h": (w_i_img, b_i_img, w_i_ft, b_i_ft),
                 "h2h": (w_h_img, b_h_img, w_h_ft, b_h_ft),
                 "bn_i2h": gn_i, "bn_h2h": gn_h}
    params_plain = {"i2h": (w_i_img, b_i_img),
                    "h2h": (w_h_img, b_h_img),
                    "bn_i2h": gn_i, "bn_h2h": gn_h}

    # flag_convFT = 1 path (Conv2dFT i2h/h2h)
    fwd_ft = jax.jit(functools.partial(crnn_cell_forward, kernel_size=K, flag_convFT=True))
    out_ft = jax.block_until_ready(fwd_ft(x, h, params_ft))
    ref_ft = ref_crnn_cell(x, h, params_ft, K, True)
    np.testing.assert_allclose(np.asarray(out_ft), np.asarray(ref_ft), rtol=2e-3, atol=2e-3)
    assert out_ft.shape == (B, hidden, H, W) and out_ft.dtype == jnp.float32

    # flag_convFT = 0 path (plain nn.Conv2d i2h/h2h, the module default) — fully fused cell
    fwd_plain = jax.jit(functools.partial(crnn_cell_forward, kernel_size=K, flag_convFT=False))
    out_plain = jax.block_until_ready(fwd_plain(x, h, params_plain))
    ref_plain = ref_crnn_cell(x, h, params_plain, K, False)
    np.testing.assert_allclose(np.asarray(out_plain), np.asarray(ref_plain), rtol=2e-3, atol=2e-3)
    assert out_plain.shape == (B, hidden, H, W) and out_plain.dtype == jnp.float32

    print("KERNEL_OK")
</pallas_src>

<mosaic_0001>
module attributes {stable_mosaic.version = 11 : i64} {
  func.func @_conv_branch_kernel(%arg0: i32, %arg1: memref<1x288x512xf32, #tpu.memory_space<vmem>>, %arg2: memref<1x32x288xf32, #tpu.memory_space<vmem>>, %arg3: memref<1x2x32x256xf32, #tpu.memory_space<vmem>>) attributes {dimension_semantics = [#tpu.dimension_semantics<parallel>], iteration_bounds = array<i64: 2>, scalar_prefetch = 0 : i64, scratch_operands = 0 : i64, tpu.core_type = #tpu.core_type<tc>, window_params = [{transform_indices = @transform_0, window_bounds = array<i64: 1, 288, 512>}, {transform_indices = @transform_1, window_bounds = array<i64: 1, 32, 288>}, {transform_indices = @transform_2, window_bounds = array<i64: 1, 2, 32, 256>}]} {
    %c0 = arith.constant 0 : index
    %c0_0 = arith.constant 0 : index
    %c0_1 = arith.constant 0 : index
    %0 = vector.load %arg2[%c0, %c0_0, %c0_1] : memref<1x32x288xf32, #tpu.memory_space<vmem>>, vector<1x32x288xf32>
    %1 = vector.shape_cast %0 : vector<1x32x288xf32> to vector<32x288xf32>
    %c0_2 = arith.constant 0 : index
    %c0_3 = arith.constant 0 : index
    %c0_4 = arith.constant 0 : index
    %2 = vector.load %arg1[%c0_2, %c0_3, %c0_4] : memref<1x288x512xf32, #tpu.memory_space<vmem>>, vector<1x288x512xf32>
    %3 = vector.shape_cast %2 : vector<1x288x512xf32> to vector<288x512xf32>
    %cst = arith.constant dense<0.000000e+00> : vector<32x512xf32>
    %4 = tpu.matmul %1, %3, %cst {dimension_numbers = #tpu.dot_dimension_numbers<[1], [0], [0], [1], [0, 0, 1, 1], [], []>} : vector<32x288xf32>, vector<288x512xf32>, vector<32x512xf32> -> vector<32x512xf32>
    %5 = vector.extract_strided_slice %4 {offsets = [0, 0], sizes = [32, 256], strides = [1, 1]} : vector<32x512xf32> to vector<32x256xf32>
    %c0_5 = arith.constant 0 : index
    %c0_6 = arith.constant 0 : index
    %c0_7 = arith.constant 0 : index
    %c0_8 = arith.constant 0 : index
    %6 = vector.load %arg3[%c0_5, %c0_6, %c0_7, %c0_8] : memref<1x2x32x256xf32, #tpu.memory_space<vmem>>, vector<1x1x32x256xf32>
    %7 = vector.shape_cast %6 : vector<1x1x32x256xf32> to vector<32x256xf32>
    %8 = vector.shape_cast %5 : vector<32x256xf32> to vector<1x1x32x256xf32>
    tpu.vector_store %arg3[%c0_5, %c0_6, %c0_7, %c0_8], %8 {strides = array<i32>} : memref<1x2x32x256xf32, #tpu.memory_space<vmem>>, vector<1x1x32x256xf32>,
    %9 = vector.extract_strided_slice %4 {offsets = [0, 256], sizes = [32, 256], strides = [1, 1]} : vector<32x512xf32> to vector<32x256xf32>
    %c0_9 = arith.constant 0 : index
    %c1 = arith.constant 1 : index
    %c0_10 = arith.constant 0 : index
    %c0_11 = arith.constant 0 : index
    %10 = vector.load %arg3[%c0_9, %c1, %c0_10, %c0_11] : memref<1x2x32x256xf32, #tpu.memory_space<vmem>>, vector<1x1x32x256xf32>
    %11 = vector.shape_cast %10 : vector<1x1x32x256xf32> to vector<32x256xf32>
    %12 = vector.shape_cast %9 : vector<32x256xf32> to vector<1x1x32x256xf32>
    tpu.vector_store %arg3[%c0_9, %c1, %c0_10, %c0_11], %12 {strides = array<i32>} : memref<1x2x32x256xf32, #tpu.memory_space<vmem>>, vector<1x1x32x256xf32>,
    return
  }
  func.func @transform_0(%arg0: i32) -> (i32, i32, i32) {
    %c0_i32 = arith.constant 0 : i32
    %c0_i32_0 = arith.constant 0 : i32
    %c0_i32_1 = arith.constant 0 : i32
    return %arg0, %c0_i32, %c0_i32_0 : i32, i32, i32
  }
  func.func @transform_1(%arg0: i32) -> (i32, i32, i32) {
    %c0_i32 = arith.constant 0 : i32
    %c0_i32_0 = arith.constant 0 : i32
    %c0_i32_1 = arith.constant 0 : i32
    return %arg0, %c0_i32, %c0_i32_0 : i32, i32, i32
  }
  func.func @transform_2(%arg0: i32) -> (i32, i32, i32, i32) {
    %c0_i32 = arith.constant 0 : i32
    %c0_i32_0 = arith.constant 0 : i32
    %c0_i32_1 = arith.constant 0 : i32
    %c0_i32_2 = arith.constant 0 : i32
    return %arg0, %c0_i32, %c0_i32_0, %c0_i32_1 : i32, i32, i32, i32
  }
}

module attributes {stable_mosaic.version = 11 : i64} {
  func.func @_gn4_add_relu_kernel(%arg0: i32, %arg1: i32, %arg2: memref<1x32x256xf32, #tpu.memory_space<vmem>>, %arg3: memref<1x32x256xf32, #tpu.memory_space<vmem>>, %arg4: memref<1x32x256xf32, #tpu.memory_space<vmem>>, %arg5: memref<1x32x256xf32, #tpu.memory_space<vmem>>, %arg6: memref<32x1xf32, #tpu.memory_space<vmem>>, %arg7: memref<32x1xf32, #tpu.memory_space<vmem>>, %arg8: memref<32x1xf32, #tpu.memory_space<vmem>>, %arg9: memref<32x1xf32, #tpu.memory_space<vmem>>, %arg10: memref<1x32x256xf32, #tpu.memory_space<vmem>>) attributes {dimension_semantics = [#tpu.dimension_semantics<parallel>, #tpu.dimension_semantics<parallel>], iteration_bounds = array<i64: 2, 1>, scalar_prefetch = 0 : i64, scratch_operands = 0 : i64, tpu.core_type = #tpu.core_type<tc>, window_params = [{transform_indices = @transform_0, window_bounds = array<i64: 1, 32, 256>}, {transform_indices = @transform_1, window_bounds = array<i64: 1, 32, 256>}, {transform_indices = @transform_2, window_bounds = array<i64: 1, 32, 256>}, {transform_indices = @transform_3, window_bounds = array<i64: 1, 32, 256>}, {transform_indices = @transform_4, window_bounds = array<i64: 32, 1>}, {transform_indices = @transform_5, window_bounds = array<i64: 32, 1>}, {transform_indices = @transform_6, window_bounds = array<i64: 32, 1>}, {transform_indices = @transform_7, window_bounds = array<i64: 32, 1>}, {transform_indices = @transform_8, window_bounds = array<i64: 1, 32, 256>}]} {
    %c0 = arith.constant 0 : index
    %c0_0 = arith.constant 0 : index
    %c0_1 = arith.constant 0 : index
    %0 = vector.load %arg2[%c0, %c0_0, %c0_1] : memref<1x32x256xf32, #tpu.memory_space<vmem>>, vector<1x32x256xf32>
    %1 = vector.shape_cast %0 : vector<1x32x256xf32> to vector<32x256xf32>
    %c0_2 = arith.constant 0 : index
    %c0_3 = arith.constant 0 : index
    %c0_4 = arith.constant 0 : index
    %2 = vector.load %arg3[%c0_2, %c0_3, %c0_4] : memref<1x32x256xf32, #tpu.memory_space<vmem>>, vector<1x32x256xf32>
    %3 = vector.shape_cast %2 : vector<1x32x256xf32> to vector<32x256xf32>
    %4 = arith.addf %1, %3 : vector<32x256xf32>
    %c0_5 = arith.constant 0 : index
    %c0_6 = arith.constant 0 : index
    %5 = vector.load %arg6[%c0_5, %c0_6] : memref<32x1xf32, #tpu.memory_space<vmem>>, vector<32x1xf32>
    %c0_7 = arith.constant 0 : index
    %c0_8 = arith.constant 0 : index
    %6 = vector.load %arg7[%c0_7, %c0_8] : memref<32x1xf32, #tpu.memory_space<vmem>>, vector<32x1xf32>
    %cst = arith.constant dense<0.000000e+00> : vector<32xf32>
    %7 = vector.multi_reduction <add>, %4, %cst [1] : vector<32x256xf32> to vector<32xf32>
    %8 = vector.shape_cast %7 : vector<32xf32> to vector<32x1xf32>
    %cst_9 = arith.constant 2.560000e+02 : f32
    %9 = vector.broadcast %cst_9 : f32 to vector<32x1xf32>
    %10 = arith.divf %8, %9 : vector<32x1xf32>
    %11 = vector.broadcast %10 : vector<32x1xf32> to vector<32x256xf32>
    %12 = arith.subf %4, %11 : vector<32x256xf32>
    %13 = arith.mulf %12, %12 : vector<32x256xf32>
    %cst_10 = arith.constant dense<0.000000e+00> : vector<32xf32>
    %14 = vector.multi_reduction <add>, %13, %cst_10 [1] : vector<32x256xf32> to vector<32xf32>
    %15 = vector.shape_cast %14 : vector<32xf32> to vector<32x1xf32>
    %cst_11 = arith.constant 2.560000e+02 : f32
    %16 = vector.broadcast %cst_11 : f32 to vector<32x1xf32>
    %17 = arith.divf %15, %16 : vector<32x1xf32>
    %cst_12 = arith.constant 9.99999974E-6 : f32
    %18 = vector.broadcast %cst_12 : f32 to vector<32x1xf32>
    %19 = arith.addf %17, %18 : vector<32x1xf32>
    %20 = math.rsqrt %19 : vector<32x1xf32>
    %21 = vector.broadcast %20 : vector<32x1xf32> to vector<32x256xf32>
    %22 = arith.mulf %12, %21 : vector<32x256xf32>
    %23 = vector.broadcast %5 : vector<32x1xf32> to vector<32x256xf32>
    %24 = arith.mulf %22, %23 : vector<32x256xf32>
    %25 = vector.broadcast %6 : vector<32x1xf32> to vector<32x256xf32>
    %26 = arith.addf %24, %25 : vector<32x256xf32>
    %c0_13 = arith.constant 0 : index
    %c0_14 = arith.constant 0 : index
    %c0_15 = arith.constant 0 : index
    %27 = vector.load %arg4[%c0_13, %c0_14, %c0_15] : memref<1x32x256xf32, #tpu.memory_space<vmem>>, vector<1x32x256xf32>
    %28 = vector.shape_cast %27 : vector<1x32x256xf32> to vector<32x256xf32>
    %c0_16 = arith.constant 0 : index
    %c0_17 = arith.constant 0 : index
    %c0_18 = arith.constant 0 : index
    %29 = vector.load %arg5[%c0_16, %c0_17, %c0_18] : memref<1x32x256xf32, #tpu.memory_space<vmem>>, vector<1x32x256xf32>
    %30 = vector.shape_cast %29 : vector<1x32x256xf32> to vector<32x256xf32>
    %31 = arith.addf %28, %30 : vector<32x256xf32>
    %c0_19 = arith.constant 0 : index
    %c0_20 = arith.constant 0 : index
    %32 = vector.load %arg8[%c0_19, %c0_20] : memref<32x1xf32, #tpu.memory_space<vmem>>, vector<32x1xf32>
    %c0_21 = arith.constant 0 : index
    %c0_22 = arith.constant 0 : index
    %33 = vector.load %arg9[%c0_21, %c0_22] : memref<32x1xf32, #tpu.memory_space<vmem>>, vector<32x1xf32>
    %cst_23 = arith.constant dense<0.000000e+00> : vector<32xf32>
    %34 = vector.multi_reduction <add>, %31, %cst_23 [1] : vector<32x256xf32> to vector<32xf32>
    %35 = vector.shape_cast %34 : vector<32xf32> to vector<32x1xf32>
    %cst_24 = arith.constant 2.560000e+02 : f32
    %36 = vector.broadcast %cst_24 : f32 to vector<32x1xf32>
    %37 = arith.divf %35, %36 : vector<32x1xf32>
    %38 = vector.broadcast %37 : vector<32x1xf32> to vector<32x256xf32>
    %39 = arith.subf %31, %38 : vector<32x256xf32>
    %40 = arith.mulf %39, %39 : vector<32x256xf32>
    %cst_25 = arith.constant dense<0.000000e+00> : vector<32xf32>
    %41 = vector.multi_reduction <add>, %40, %cst_25 [1] : vector<32x256xf32> to vector<32xf32>
    %42 = vector.shape_cast %41 : vector<32xf32> to vector<32x1xf32>
    %cst_26 = arith.constant 2.560000e+02 : f32
    %43 = vector.broadcast %cst_26 : f32 to vector<32x1xf32>
    %44 = arith.divf %42, %43 : vector<32x1xf32>
    %cst_27 = arith.constant 9.99999974E-6 : f32
    %45 = vector.broadcast %cst_27 : f32 to vector<32x1xf32>
    %46 = arith.addf %44, %45 : vector<32x1xf32>
    %47 = math.rsqrt %46 : vector<32x1xf32>
    %48 = vector.broadcast %47 : vector<32x1xf32> to vector<32x256xf32>
    %49 = arith.mulf %39, %48 : vector<32x256xf32>
    %50 = vector.broadcast %32 : vector<32x1xf32> to vector<32x256xf32>
    %51 = arith.mulf %49, %50 : vector<32x256xf32>
    %52 = vector.broadcast %33 : vector<32x1xf32> to vector<32x256xf32>
    %53 = arith.addf %51, %52 : vector<32x256xf32>
    %54 = arith.addf %26, %53 : vector<32x256xf32>
    %cst_28 = arith.constant 0.000000e+00 : f32
    %55 = vector.broadcast %cst_28 : f32 to vector<32x256xf32>
    %56 = arith.maximumf %54, %55 : vector<32x256xf32>
    %c0_29 = arith.constant 0 : index
    %c0_30 = arith.constant 0 : index
    %c0_31 = arith.constant 0 : index
    %57 = vector.load %arg10[%c0_29, %c0_30, %c0_31] : memref<1x32x256xf32, #tpu.memory_space<vmem>>, vector<1x32x256xf32>
    %58 = vector.shape_cast %57 : vector<1x32x256xf32> to vector<32x256xf32>
    %59 = vector.shape_cast %56 : vector<32x256xf32> to vector<1x32x256xf32>
    tpu.vector_store %arg10[%c0_29, %c0_30, %c0_31], %59 {strides = array<i32>} : memref<1x32x256xf32, #tpu.memory_space<vmem>>, vector<1x32x256xf32>,
    return
  }
  func.func @transform_0(%arg0: i32, %arg1: i32) -> (i32, i32, i32) {
    %c0_i32 = arith.constant 0 : i32
    %c0_i32_0 = arith.constant 0 : i32
    return %arg0, %arg1, %c0_i32 : i32, i32, i32
  }
  func.func @transform_1(%arg0: i32, %arg1: i32) -> (i32, i32, i32) {
    %c0_i32 = arith.constant 0 : i32
    %c0_i32_0 = arith.constant 0 : i32
    return %arg0, %arg1, %c0_i32 : i32, i32, i32
  }
  func.func @transform_2(%arg0: i32, %arg1: i32) -> (i32, i32, i32) {
    %c0_i32 = arith.constant 0 : i32
    %c0_i32_0 = arith.constant 0 : i32
    return %arg0, %arg1, %c0_i32 : i32, i32, i32
  }
  func.func @transform_3(%arg0: i32, %arg1: i32) -> (i32, i32, i32) {
    %c0_i32 = arith.constant 0 : i32
    %c0_i32_0 = arith.constant 0 : i32
    return %arg0, %arg1, %c0_i32 : i32, i32, i32
  }
  func.func @transform_4(%arg0: i32, %arg1: i32) -> (i32, i32) {
    %c0_i32 = arith.constant 0 : i32
    %c0_i32_0 = arith.constant 0 : i32
    return %arg1, %c0_i32 : i32, i32
  }
  func.func @transform_5(%arg0: i32, %arg1: i32) -> (i32, i32) {
    %c0_i32 = arith.constant 0 : i32
    %c0_i32_0 = arith.constant 0 : i32
    return %arg1, %c0_i32 : i32, i32
  }
  func.func @transform_6(%arg0: i32, %arg1: i32) -> (i32, i32) {
    %c0_i32 = arith.constant 0 : i32
    %c0_i32_0 = arith.constant 0 : i32
    return %arg1, %c0_i32 : i32, i32
  }
  func.func @transform_7(%arg0: i32, %arg1: i32) -> (i32, i32) {
    %c0_i32 = arith.constant 0 : i32
    %c0_i32_0 = arith.constant 0 : i32
    return %arg1, %c0_i32 : i32, i32
  }
  func.func @transform_8(%arg0: i32, %arg1: i32) -> (i32, i32, i32) {
    %c0_i32 = arith.constant 0 : i32
    %c0_i32_0 = arith.constant 0 : i32
    return %arg0, %arg1, %c0_i32 : i32, i32, i32
  }
}

module attributes {stable_mosaic.version = 11 : i64} {
  func.func @_conv_branch_kernel(%arg0: i32, %arg1: memref<1x36x512xf32, #tpu.memory_space<vmem>>, %arg2: memref<1x32x36xf32, #tpu.memory_space<vmem>>, %arg3: memref<1x2x32x256xf32, #tpu.memory_space<vmem>>) attributes {dimension_semantics = [#tpu.dimension_semantics<parallel>], iteration_bounds = array<i64: 2>, scalar_prefetch = 0 : i64, scratch_operands = 0 : i64, tpu.core_type = #tpu.core_type<tc>, window_params = [{transform_indices = @transform_0, window_bounds = array<i64: 1, 36, 512>}, {transform_indices = @transform_1, window_bounds = array<i64: 1, 32, 36>}, {transform_indices = @transform_2, window_bounds = array<i64: 1, 2, 32, 256>}]} {
    %c0 = arith.constant 0 : index
    %c0_0 = arith.constant 0 : index
    %c0_1 = arith.constant 0 : index
    %0 = vector.load %arg2[%c0, %c0_0, %c0_1] : memref<1x32x36xf32, #tpu.memory_space<vmem>>, vector<1x32x36xf32>
    %1 = vector.shape_cast %0 : vector<1x32x36xf32> to vector<32x36xf32>
    %c0_2 = arith.constant 0 : index
    %c0_3 = arith.constant 0 : index
    %c0_4 = arith.constant 0 : index
    %2 = vector.load %arg1[%c0_2, %c0_3, %c0_4] : memref<1x36x512xf32, #tpu.memory_space<vmem>>, vector<1x36x512xf32>
    %3 = vector.shape_cast %2 : vector<1x36x512xf32> to vector<36x512xf32>
    %cst = arith.constant dense<0.000000e+00> : vector<32x512xf32>
    %4 = tpu.matmul %1, %3, %cst {dimension_numbers = #tpu.dot_dimension_numbers<[1], [0], [0], [1], [0, 0, 1, 1], [], []>} : vector<32x36xf32>, vector<36x512xf32>, vector<32x512xf32> -> vector<32x512xf32>
    %5 = vector.extract_strided_slice %4 {offsets = [0, 0], sizes = [32, 256], strides = [1, 1]} : vector<32x512xf32> to vector<32x256xf32>
    %c0_5 = arith.constant 0 : index
    %c0_6 = arith.constant 0 : index
    %c0_7 = arith.constant 0 : index
    %c0_8 = arith.constant 0 : index
    %6 = vector.load %arg3[%c0_5, %c0_6, %c0_7, %c0_8] : memref<1x2x32x256xf32, #tpu.memory_space<vmem>>, vector<1x1x32x256xf32>
    %7 = vector.shape_cast %6 : vector<1x1x32x256xf32> to vector<32x256xf32>
    %8 = vector.shape_cast %5 : vector<32x256xf32> to vector<1x1x32x256xf32>
    tpu.vector_store %arg3[%c0_5, %c0_6, %c0_7, %c0_8], %8 {strides = array<i32>} : memref<1x2x32x256xf32, #tpu.memory_space<vmem>>, vector<1x1x32x256xf32>,
    %9 = vector.extract_strided_slice %4 {offsets = [0, 256], sizes = [32, 256], strides = [1, 1]} : vector<32x512xf32> to vector<32x256xf32>
    %c0_9 = arith.constant 0 : index
    %c1 = arith.constant 1 : index
    %c0_10 = arith.constant 0 : index
    %c0_11 = arith.constant 0 : index
    %10 = vector.load %arg3[%c0_9, %c1, %c0_10, %c0_11] : memref<1x2x32x256xf32, #tpu.memory_space<vmem>>, vector<1x1x32x256xf32>
    %11 = vector.shape_cast %10 : vector<1x1x32x256xf32> to vector<32x256xf32>
    %12 = vector.shape_cast %9 : vector<32x256xf32> to vector<1x1x32x256xf32>
    tpu.vector_store %arg3[%c0_9, %c1, %c0_10, %c0_11], %12 {strides = array<i32>} : memref<1x2x32x256xf32, #tpu.memory_space<vmem>>, vector<1x1x32x256xf32>,
    return
  }
  func.func @transform_0(%arg0: i32) -> (i32, i32, i32) {
    %c0_i32 = arith.constant 0 : i32
    %c0_i32_0 = arith.constant 0 : i32
    %c0_i32_1 = arith.constant 0 : i32
    return %arg0, %c0_i32, %c0_i32_0 : i32, i32, i32
  }
  func.func @transform_1(%arg0: i32) -> (i32, i32, i32) {
    %c0_i32 = arith.constant 0 : i32
    %c0_i32_0 = arith.constant 0 : i32
    %c0_i32_1 = arith.constant 0 : i32
    return %arg0, %c0_i32, %c0_i32_0 : i32, i32, i32
  }
  func.func @transform_2(%arg0: i32) -> (i32, i32, i32, i32) {
    %c0_i32 = arith.constant 0 : i32
    %c0_i32_0 = arith.constant 0 : i32
    %c0_i32_1 = arith.constant 0 : i32
    %c0_i32_2 = arith.constant 0 : i32
    return %arg0, %c0_i32, %c0_i32_0, %c0_i32_1 : i32, i32, i32, i32
  }
}

</mosaic_0001>

<bundles_post_ra>
// kernel: crnn_cell_forward.4
= control target key start
LH: loop header
LB: loop body
LE: loop exit
PB: predicated region body
PF: predicated region fallthrough
CT: control target
= control target key end

     0   :  { %s996_s9 = smov 0   ;;  %s1207_s0 = inlined_call_operand.vmem [shape: f32[2,288,512], index: 0, kind: input, shape index: {}]   ;;  %s1208_s1 = inlined_call_operand.vmem [shape: f32[2,32,288], index: 1, kind: input, shape index: {}]   ;;  %s1209_s2 = inlined_call_operand.vmem [shape: f32[2,2,32,256], index: 2, kind: output, shape index: {}]  }
   0x1 LB: > { %s773_s10 = sadd.s32 4294967295, %s978_s9   ;;  %p777_p0 = scmp.ge.s32.totalorder %s978_s9, 1  ;;  %s978_s9 = sphi %s996_s9, %s12_s9  }
   0x2   : > { %p122_p1 = scmp.lt.s32.totalorder %s978_s9, 3 }
   0x4   : > { %p123_p2 = pnand %p777_p0, %p122_p1 }
   0x5   : > { %p149_p3 = scmp.lt.s32.totalorder (!%p123_p2), %s773_s10, 1  ;;  %vm320_vm0 = vcmask (!%p123_p2), 261120  }
   0x6   : > { %126 = sbr.rel (%p123_p2) target bundleno = 328 (0x148), region = 28 }
   0xd   : > { %s1211_s10 = smov (!%p149_p3, %s773_s10), 1 }
   0xe   : > { %s961_s11 = smul.u32 1152, %s1211_s10  ;;  %s800_s19 = sshll.u32 %s1211_s10, 7 }
   0xf   : > { %s962_s15 = smul.u32 96, %s1211_s10  ;;  %s1186_s22 = scalar_lea.vmem %s1209_s2, %s800_s19 }
  0x10   : > { %s1010_s14 = scalar_lea.vmem %s1207_s0, %s961_s11 }
  0x11   : > { %v177_v0 = vld [vmem:[%s1010_s14 + $0x8] sm:$0xff]  ;;  %v179_v2 = vld [vmem:[%s1010_s14 + $0x18] sm:$0xff]  ;;  %v176_v5 = vld [vmem:[%s1010_s14] sm:$0xff]  ;;  %s1108_s18 = scalar_lea.vmem %s1208_s1, %s962_s15 }
  0x12   : > { %v181_v1 = vld [vmem:[%s1010_s14 + $0x28] sm:$0xff]  ;;  %v183_v4 = vld [vmem:[%s1010_s14 + $0x38] sm:$0xff]  ;;  %v180_v6 = vld [vmem:[%s1010_s14 + $0x20] sm:$0xff] }
  0x13   : > { %v801_v3 = vpack.c.bf16 %v181_v1, %v177_v0  ;;  %v873_v7 = vpack.c.bf16 %v183_v4, %v179_v2  ;;  %v803_v8 = vpack.c.bf16 %v180_v6, %v176_v5  ;;  %v178_v9 = vld [vmem:[%s1010_s14 + $0x10] sm:$0xff]  ;;  %v185_v11 = vld [vmem:[%s1010_s14 + $0x48] sm:$0xff]  ;;  %v187_v14 = vld [vmem:[%s1010_s14 + $0x58] sm:$0xff] }
  0x14   : > { %v182_v10 = vld [vmem:[%s1010_s14 + $0x30] sm:$0xff]  ;;  %v189_v13 = vld [vmem:[%s1010_s14 + $0x68] sm:$0xff]  ;;  %v191_v15 = vld [vmem:[%s1010_s14 + $0x78] sm:$0xff] }
  0x15   : > { %802 = vmatprep.subr.bf16.mxu0 %v801_v3  ;;  %v875_v12 = vpack.c.bf16 %v182_v10, %v178_v9  ;;  %874 = vmatprep.subr.bf16.mxu1 %v873_v7  ;;  %v805_v16 = vpack.c.bf16 %v189_v13, %v185_v11  ;;  %v877_v17 = vpack.c.bf16 %v191_v15, %v187_v14  ;;  %v184_v18 = vld [vmem:[%s1010_s14 + $0x40] sm:$0xff]  ;;  %v186_v20 = vld [vmem:[%s1010_s14 + $0x50] sm:$0xff]  ;;  %v193_v23 = vld [vmem:[%s1010_s14 + $0x88] sm:$0xff] }
  0x16   : > { %804 = vmatpush1.bf16.msra.mxu0 %v803_v8  ;;  %v188_v19 = vld [vmem:[%s1010_s14 + $0x60] sm:$0xff]  ;;  %v190_v22 = vld [vmem:[%s1010_s14 + $0x70] sm:$0xff]  ;;  %v197_v24 = vld [vmem:[%s1010_s14 + $0xa8] sm:$0xff] }
  0x17   : > { %876 = vmatpush1.bf16.msra.mxu1 %v875_v12  ;;  %v807_v21 = vpack.c.bf16 %v188_v19, %v184_v18  ;;  %806 = vmatprep.subr.bf16.mxu0 %v805_v16  ;;  %v879_v25 = vpack.c.bf16 %v190_v22, %v186_v20  ;;  %v809_v26 = vpack.c.bf16 %v197_v24, %v193_v23  ;;  %v195_v27 = vld [vmem:[%s1010_s14 + $0x98] sm:$0xff]  ;;  %v192_v29 = vld [vmem:[%s1010_s14 + $0x80] sm:$0xff]  ;;  %v194_v32 = vld [vmem:[%s1010_s14 + $0x90] sm:$0xff] }
  0x18   : > { %878 = vmatprep.subr.bf16.mxu1 %v877_v17  ;;  %v199_v28 = vld [vmem:[%s1010_s14 + $0xb8] sm:$0xff]  ;;  %v196_v31 = vld [vmem:[%s1010_s14 + $0xa0] sm:$0xff]  ;;  %v198_v33 = vld [vmem:[%s1010_s14 + $0xb0] sm:$0xff] }
  0x19   : > { %v881_v30 = vpack.c.bf16 %v199_v28, %v195_v27  ;;  %v811_v34 = vpack.c.bf16 %v196_v31, %v192_v29  ;;  %v201_v35 = vld [vmem:[%s1010_s14 + $0xc8] sm:$0xff]  ;;  %v203_v37 = vld [vmem:[%s1010_s14 + $0xd8] sm:$0xff]  ;;  %v883_v38 = vpack.c.bf16 %v198_v33, %v194_v32  ;;  %v200_v41 = vld [vmem:[%s1010_s14 + $0xc0] sm:$0xff] }
  0x1a   : > { %808 = vmatpush1.bf16.msra.mxu0 %v807_v21  ;;  %v205_v36 = vld [vmem:[%s1010_s14 + $0xe8] sm:$0xff]  ;;  %v207_v40 = vld [vmem:[%s1010_s14 + $0xf8] sm:$0xff]  ;;  %v204_v42 = vld [vmem:[%s1010_s14 + $0xe0] sm:$0xff] }
  0x1b   : > { %880 = vmatpush1.bf16.msra.mxu1 %v879_v25  ;;  %810 = vmatprep.subr.bf16.mxu0 %v809_v26  ;;  %v813_v39 = vpack.c.bf16 %v205_v36, %v201_v35  ;;  %v885_v43 = vpack.c.bf16 %v207_v40, %v203_v37  ;;  %v202_v44 = vld [vmem:[%s1010_s14 + $0xd0] sm:$0xff]  ;;  %v209_v46 = vld [vmem:[%s1010_s14 + $0x108] sm:$0xff]  ;;  %v211_v48 = vld [vmem:[%s1010_s14 + $0x118] sm:$0xff]  ;;  %v815_v50 = vpack.c.bf16 %v204_v42, %v200_v41 }
  0x1c   : > { %882 = vmatprep.subr.bf16.mxu1 %v881_v30  ;;  %v206_v45 = vld [vmem:[%s1010_s14 + $0xf0] sm:$0xff]  ;;  %v213_v47 = vld [vmem:[%s1010_s14 + $0x128] sm:$0xff]  ;;  %v215_v49 = vld [vmem:[%s1010_s14 + $0x138] sm:$0xff] }
  0x1d   : > { %v887_v51 = vpack.c.bf16 %v206_v45, %v202_v44  ;;  %v817_v52 = vpack.c.bf16 %v213_v47, %v209_v46  ;;  %v208_v53 = vld [vmem:[%s1010_s14 + $0x100] sm:$0xff]  ;;  %v210_v55 = vld [vmem:[%s1010_s14 + $0x110] sm:$0xff]  ;;  %v889_v56 = vpack.c.bf16 %v215_v49, %v211_v48  ;;  %v217_v58 = vld [vmem:[%s1010_s14 + $0x148] sm:$0xff] }
  0x1e   : > { %812 = vmatpush1.bf16.msra.mxu0 %v811_v34  ;;  %v212_v54 = vld [vmem:[%s1010_s14 + $0x120] sm:$0xff]  ;;  %v214_v57 = vld [vmem:[%s1010_s14 + $0x130] sm:$0xff]  ;;  %v221_v59 = vld [vmem:[%s1010_s14 + $0x168] sm:$0xff] }
  0x1f   : > { %884 = vmatpush1.bf16.msra.mxu1 %v883_v38  ;;  %814 = vmatprep.subr.bf16.mxu0 %v813_v39  ;;  %v219_v60 = vld [vmem:[%s1010_s14 + $0x158] sm:$0xff]  ;;  %v819_v62 = vpack.c.bf16 %v212_v54, %v208_v53  ;;  %v891_v63 = vpack.c.bf16 %v214_v57, %v210_v55  ;;  %v821_v0 = vpack.c.bf16 %v221_v59, %v217_v58  ;;  %v216_v1 = vld [vmem:[%s1010_s14 + $0x140] sm:$0xff]  ;;  %v218_v3 = vld [vmem:[%s1010_s14 + $0x150] sm:$0xff] }
  0x20   : > { %886 = vmatprep.subr.bf16.mxu1 %v885_v43  ;;  %v223_v61 = vld [vmem:[%s1010_s14 + $0x178] sm:$0xff]  ;;  %v220_v2 = vld [vmem:[%s1010_s14 + $0x160] sm:$0xff]  ;;  %v222_v5 = vld [vmem:[%s1010_s14 + $0x170] sm:$0xff] }
  0x21   : > { %v893_v4 = vpack.c.bf16 %v223_v61, %v219_v60  ;;  %v225_v6 = vld [vmem:[%s1010_s14 + $0x188] sm:$0xff]  ;;  %v227_v8 = vld [vmem:[%s1010_s14 + $0x198] sm:$0xff]  ;;  %v823_v10 = vpack.c.bf16 %v220_v2, %v216_v1  ;;  %v895_v11 = vpack.c.bf16 %v222_v5, %v218_v3  ;;  %v224_v13 = vld [vmem:[%s1010_s14 + $0x180] sm:$0xff] }
  0x22   : > { %816 = vmatpush1.bf16.msra.mxu0 %v815_v50  ;;  %v229_v7 = vld [vmem:[%s1010_s14 + $0x1a8] sm:$0xff]  ;;  %v231_v9 = vld [vmem:[%s1010_s14 + $0x1b8] sm:$0xff]  ;;  %v228_v14 = vld [vmem:[%s1010_s14 + $0x1a0] sm:$0xff] }
  0x23   : > { %888 = vmatpush1.bf16.msra.mxu1 %v887_v51  ;;  %818 = vmatprep.subr.bf16.mxu0 %v817_v52  ;;  %v825_v12 = vpack.c.bf16 %v229_v7, %v225_v6  ;;  %v226_v15 = vld [vmem:[%s1010_s14 + $0x190] sm:$0xff]  ;;  %v897_v16 = vpack.c.bf16 %v231_v9, %v227_v8  ;;  %v233_v18 = vld [vmem:[%s1010_s14 + $0x1c8] sm:$0xff]  ;;  %v235_v20 = vld [vmem:[%s1010_s14 + $0x1d8] sm:$0xff]  ;;  %v827_v22 = vpack.c.bf16 %v228_v14, %v224_v13 }
  0x24   : > { %890 = vmatprep.subr.bf16.mxu1 %v889_v56  ;;  %v230_v17 = vld [vmem:[%s1010_s14 + $0x1b0] sm:$0xff]  ;;  %v237_v19 = vld [vmem:[%s1010_s14 + $0x1e8] sm:$0xff]  ;;  %v239_v21 = vld [vmem:[%s1010_s14 + $0x1f8] sm:$0xff] }
  0x25   : > { %v899_v23 = vpack.c.bf16 %v230_v17, %v226_v15  ;;  %v829_v24 = vpack.c.bf16 %v237_v19, %v233_v18  ;;  %v232_v25 = vld [vmem:[%s1010_s14 + $0x1c0] sm:$0xff]  ;;  %v234_v27 = vld [vmem:[%s1010_s14 + $0x1d0] sm:$0xff]  ;;  %v901_v28 = vpack.c.bf16 %v239_v21, %v235_v20  ;;  %v241_v30 = vld [vmem:[%s1010_s14 + $0x208] sm:$0xff] }
  0x26   : > { %820 = vmatpush1.bf16.msra.mxu0 %v819_v62  ;;  %v236_v26 = vld [vmem:[%s1010_s14 + $0x1e0] sm:$0xff]  ;;  %v238_v29 = vld [vmem:[%s1010_s14 + $0x1f0] sm:$0xff]  ;;  %v245_v31 = vld [vmem:[%s1010_s14 + $0x228] sm:$0xff] }
  0x27   : > { %892 = vmatpush1.bf16.msra.mxu1 %v891_v63  ;;  %822 = vmatprep.subr.bf16.mxu0 %v821_v0  ;;  %v243_v32 = vld [vmem:[%s1010_s14 + $0x218] sm:$0xff]  ;;  %v831_v34 = vpack.c.bf16 %v236_v26, %v232_v25  ;;  %v903_v35 = vpack.c.bf16 %v238_v29, %v234_v27  ;;  %v833_v36 = vpack.c.bf16 %v245_v31, %v241_v30  ;;  %v240_v37 = vld [vmem:[%s1010_s14 + $0x200] sm:$0xff]  ;;  %v242_v39 = vld [vmem:[%s1010_s14 + $0x210] sm:$0xff] }
  0x28   : > { %894 = vmatprep.subr.bf16.mxu1 %v893_v4  ;;  %v247_v33 = vld [vmem:[%s1010_s14 + $0x238] sm:$0xff]  ;;  %v244_v38 = vld [vmem:[%s1010_s14 + $0x220] sm:$0xff]  ;;  %v246_v41 = vld [vmem:[%s1010_s14 + $0x230] sm:$0xff] }
  0x29   : > { %v905_v40 = vpack.c.bf16 %v247_v33, %v243_v32  ;;  %v249_v42 = vld [vmem:[%s1010_s14 + $0x248] sm:$0xff]  ;;  %v251_v44 = vld [vmem:[%s1010_s14 + $0x258] sm:$0xff]  ;;  %v835_v46 = vpack.c.bf16 %v244_v38, %v240_v37  ;;  %v907_v47 = vpack.c.bf16 %v246_v41, %v242_v39  ;;  %v248_v49 = vld [vmem:[%s1010_s14 + $0x240] sm:$0xff] }
  0x2a   : > { %824 = vmatpush1.bf16.msra.mxu0 %v823_v10  ;;  %v253_v43 = vld [vmem:[%s1010_s14 + $0x268] sm:$0xff]  ;;  %v255_v45 = vld [vmem:[%s1010_s14 + $0x278] sm:$0xff]  ;;  %v252_v50 = vld [vmem:[%s1010_s14 + $0x260] sm:$0xff] }
  0x2b   : > { %896 = vmatpush1.bf16.msra.mxu1 %v895_v11  ;;  %826 = vmatprep.subr.bf16.mxu0 %v825_v12  ;;  %v837_v48 = vpack.c.bf16 %v253_v43, %v249_v42  ;;  %v250_v51 = vld [vmem:[%s1010_s14 + $0x250] sm:$0xff]  ;;  %v909_v52 = vpack.c.bf16 %v255_v45, %v251_v44  ;;  %v257_v54 = vld [vmem:[%s1010_s14 + $0x288] sm:$0xff]  ;;  %v259_v56 = vld [vmem:[%s1010_s14 + $0x298] sm:$0xff]  ;;  %v839_v58 = vpack.c.bf16 %v252_v50, %v248_v49 }
  0x2c   : > { %898 = vmatprep.subr.bf16.mxu1 %v897_v16  ;;  %v254_v53 = vld [vmem:[%s1010_s14 + $0x270] sm:$0xff]  ;;  %v261_v55 = vld [vmem:[%s1010_s14 + $0x2a8] sm:$0xff]  ;;  %v263_v57 = vld [vmem:[%s1010_s14 + $0x2b8] sm:$0xff] }
  0x2d   : > { %v911_v59 = vpack.c.bf16 %v254_v53, %v250_v51  ;;  %v841_v60 = vpack.c.bf16 %v261_v55, %v257_v54  ;;  %v256_v61 = vld [vmem:[%s1010_s14 + $0x280] sm:$0xff]  ;;  %v258_v63 = vld [vmem:[%s1010_s14 + $0x290] sm:$0xff]  ;;  %v913_v0 = vpack.c.bf16 %v263_v57, %v259_v56  ;;  %v265_v2 = vld [vmem:[%s1010_s14 + $0x2c8] sm:$0xff] }
  0x2e   : > { %828 = vmatpush1.bf16.msra.mxu0 %v827_v22  ;;  %v260_v62 = vld [vmem:[%s1010_s14 + $0x2a0] sm:$0xff]  ;;  %v262_v1 = vld [vmem:[%s1010_s14 + $0x2b0] sm:$0xff]  ;;  %v269_v3 = vld [vmem:[%s1010_s14 + $0x2e8] sm:$0xff] }
  0x2f   : > { %900 = vmatpush1.bf16.msra.mxu1 %v899_v23  ;;  %830 = vmatprep.subr.bf16.mxu0 %v829_v24  ;;  %v267_v4 = vld [vmem:[%s1010_s14 + $0x2d8] sm:$0xff]  ;;  %v843_v6 = vpack.c.bf16 %v260_v62, %v256_v61  ;;  %v264_v7 = vld [vmem:[%s1010_s14 + $0x2c0] sm:$0xff]  ;;  %v915_v8 = vpack.c.bf16 %v262_v1, %v258_v63  ;;  %v845_v9 = vpack.c.bf16 %v269_v3, %v265_v2  ;;  %v266_v11 = vld [vmem:[%s1010_s14 + $0x2d0] sm:$0xff] }
  0x30   : > { %902 = vmatprep.subr.bf16.mxu1 %v901_v28  ;;  %v271_v5 = vld [vmem:[%s1010_s14 + $0x2f8] sm:$0xff]  ;;  %v268_v10 = vld [vmem:[%s1010_s14 + $0x2e0] sm:$0xff]  ;;  %v270_v12 = vld [vmem:[%s1010_s14 + $0x2f0] sm:$0xff] }
  0x31   : > { %v917_v13 = vpack.c.bf16 %v271_v5, %v267_v4  ;;  %v273_v14 = vld [vmem:[%s1010_s14 + $0x308] sm:$0xff]  ;;  %v275_v17 = vld [vmem:[%s1010_s14 + $0x318] sm:$0xff]  ;;  %v847_v19 = vpack.c.bf16 %v268_v10, %v264_v7  ;;  %v919_v20 = vpack.c.bf16 %v270_v12, %v266_v11  ;;  %v272_v22 = vld [vmem:[%s1010_s14 + $0x300] sm:$0xff] }
  0x32   : > { %832 = vmatpush1.bf16.msra.mxu0 %v831_v34  ;;  %v277_v15 = vld [vmem:[%s1010_s14 + $0x328] sm:$0xff]  ;;  %v279_v18 = vld [vmem:[%s1010_s14 + $0x338] sm:$0xff]  ;;  %v276_v23 = vld [vmem:[%s1010_s14 + $0x320] sm:$0xff] }
  0x33   : > { %904 = vmatpush1.bf16.msra.mxu1 %v903_v35  ;;  %834 = vmatprep.subr.bf16.mxu0 %v833_v36  ;;  %v165_v16 = vld [vmem:[%s1108_s18 + $0x8] sm:$0xff]  ;;  %v849_v21 = vpack.c.bf16 %v277_v15, %v273_v14  ;;  %v274_v24 = vld [vmem:[%s1010_s14 + $0x310] sm:$0xff]  ;;  %v921_v25 = vpack.c.bf16 %v279_v18, %v275_v17  ;;  %v283_v29 = vld [vmem:[%s1010_s14 + $0x358] sm:$0xff]  ;;  %v851_v31 = vpack.c.bf16 %v276_v23, %v272_v22 }
  0x34   : > { %906 = vmatprep.subr.bf16.mxu1 %v905_v40  ;;  %397 = vmatprep.mubr.f32.mxu0 %v165_v16  ;;  %v278_v26 = vld [vmem:[%s1010_s14 + $0x330] sm:$0xff]  ;;  %v281_v27 = vld [vmem:[%s1010_s14 + $0x348] sm:$0xff]  ;;  %v287_v30 = vld [vmem:[%s1010_s14 + $0x378] sm:$0xff] }
  0x35   : > { %575 = vmatprep.mubr.f32.mxu1 %v165_v16  ;;  %v285_v28 = vld [vmem:[%s1010_s14 + $0x368] sm:$0xff]  ;;  %v923_v32 = vpack.c.bf16 %v278_v26, %v274_v24  ;;  %v280_v34 = vld [vmem:[%s1010_s14 + $0x340] sm:$0xff]  ;;  %v282_v36 = vld [vmem:[%s1010_s14 + $0x350] sm:$0xff]  ;;  %v925_v37 = vpack.c.bf16 %v287_v30, %v283_v29 }
  0x36   : > { %836 = vmatpush1.bf16.msra.mxu0 %v835_v46  ;;  %v853_v33 = vpack.c.bf16 %v285_v28, %v281_v27  ;;  %v284_v35 = vld [vmem:[%s1010_s14 + $0x360] sm:$0xff]  ;;  %v286_v38 = vld [vmem:[%s1010_s14 + $0x370] sm:$0xff]  ;;  %v289_v39 = vld [vmem:[%s1010_s14 + $0x388] sm:$0xff] }
  0x37   : > { %908 = vmatpush1.bf16.msra.mxu1 %v907_v47  ;;  %838 = vmatprep.subr.bf16.mxu0 %v837_v48  ;;  %v293_v40 = vld [vmem:[%s1010_s14 + $0x3a8] sm:$0xff]  ;;  %v291_v41 = vld [vmem:[%s1010_s14 + $0x398] sm:$0xff]  ;;  %v855_v43 = vpack.c.bf16 %v284_v35, %v280_v34  ;;  %v927_v44 = vpack.c.bf16 %v286_v38, %v282_v36  ;;  %v288_v46 = vld [vmem:[%s1010_s14 + $0x380] sm:$0xff] }
  0x38   : > { %910 = vmatprep.subr.bf16.mxu1 %v909_v52  ;;  %v295_v42 = vld [vmem:[%s1010_s14 + $0x3b8] sm:$0xff]  ;;  %v857_v45 = vpack.c.bf16 %v293_v40, %v289_v39  ;;  %v292_v47 = vld [vmem:[%s1010_s14 + $0x3a0] sm:$0xff]  ;;  %v290_v48 = vld [vmem:[%s1010_s14 + $0x390] sm:$0xff] }
  0x39   : > { %v929_v49 = vpack.c.bf16 %v295_v42, %v291_v41  ;;  %v294_v50 = vld [vmem:[%s1010_s14 + $0x3b0] sm:$0xff]  ;;  %v297_v51 = vld [vmem:[%s1010_s14 + $0x3c8] sm:$0xff]  ;;  %v299_v53 = vld [vmem:[%s1010_s14 + $0x3d8] sm:$0xff]  ;;  %v859_v55 = vpack.c.bf16 %v292_v47, %v288_v46 }
  0x3a   : > { %840 = vmatpush1.bf16.msra.mxu0 %v839_v58  ;;  %v301_v52 = vld [vmem:[%s1010_s14 + $0x3e8] sm:$0xff]  ;;  %v303_v54 = vld [vmem:[%s1010_s14 + $0x3f8] sm:$0xff]  ;;  %v931_v56 = vpack.c.bf16 %v294_v50, %v290_v48  ;;  %v296_v58 = vld [vmem:[%s1010_s14 + $0x3c0] sm:$0xff] }
  0x3b   : > { %912 = vmatpush1.bf16.msra.mxu1 %v911_v59  ;;  %842 = vmatprep.subr.bf16.mxu0 %v841_v60  ;;  %v861_v57 = vpack.c.bf16 %v301_v52, %v297_v51  ;;  %v300_v59 = vld [vmem:[%s1010_s14 + $0x3e0] sm:$0xff]  ;;  %v298_v60 = vld [vmem:[%s1010_s14 + $0x3d0] sm:$0xff]  ;;  %v933_v61 = vpack.c.bf16 %v303_v54, %v299_v53  ;;  %v305_v63 = vld [vmem:[%s1010_s14 + $0x408] sm:$0xff] }
  0x3c   : > { %914 = vmatprep.subr.bf16.mxu1 %v913_v0  ;;  %v302_v62 = vld [vmem:[%s1010_s14 + $0x3f0] sm:$0xff]  ;;  %v309_v0 = vld [vmem:[%s1010_s14 + $0x428] sm:$0xff]  ;;  %v307_v1 = vld [vmem:[%s1010_s14 + $0x418] sm:$0xff]  ;;  %v863_v3 = vpack.c.bf16 %v300_v59, %v296_v58 }
  0x3d   : > { %v311_v2 = vld [vmem:[%s1010_s14 + $0x438] sm:$0xff]  ;;  %v935_v4 = vpack.c.bf16 %v302_v62, %v298_v60  ;;  %v865_v5 = vpack.c.bf16 %v309_v0, %v305_v63  ;;  %v308_v7 = vld [vmem:[%s1010_s14 + $0x420] sm:$0xff]  ;;  %v310_v10 = vld [vmem:[%s1010_s14 + $0x430] sm:$0xff] }
  0x3e   : > { %844 = vmatpush1.bf16.msra.mxu0 %v843_v6  ;;  %v304_v6 = vld [vmem:[%s1010_s14 + $0x400] sm:$0xff]  ;;  %v313_v11 = vld [vmem:[%s1010_s14 + $0x448] sm:$0xff]  ;;  %v315_v15 = vld [vmem:[%s1010_s14 + $0x458] sm:$0xff] }
  0x3f   : > { %916 = vmatpush1.bf16.msra.mxu1 %v915_v8  ;;  %846 = vmatprep.subr.bf16.mxu0 %v845_v9  ;;  %v937_v8 = vpack.c.bf16 %v311_v2, %v307_v1  ;;  %v306_v9 = vld [vmem:[%s1010_s14 + $0x410] sm:$0xff]  ;;  %v317_v12 = vld [vmem:[%s1010_s14 + $0x468] sm:$0xff]  ;;  %v867_v14 = vpack.c.bf16 %v308_v7, %v304_v6  ;;  %v319_v16 = vld [vmem:[%s1010_s14 + $0x478] sm:$0xff] }
  0x40   : > { %918 = vmatprep.subr.bf16.mxu1 %v917_v13  ;;  %v164_v13 = vld [vmem:[%s1108_s18] sm:$0xff]  ;;  %v939_v17 = vpack.c.bf16 %v310_v10, %v306_v9  ;;  %v941_v22 = vpack.c.bf16 %v319_v16, %v315_v15  ;;  %v314_v23 = vld [vmem:[%s1010_s14 + $0x450] sm:$0xff]  ;;  %v171_v26 = vld [vmem:[%s1108_s18 + $0x38] sm:$0xff] }
  0x41   : > { %v168_v18 = vld [vmem:[%s1108_s18 + $0x20] sm:$0xff]  ;;  %v318_v24 = vld [vmem:[%s1010_s14 + $0x470] sm:$0xff]  ;;  %v169_v34 = vld [vmem:[%s1108_s18 + $0x28] sm:$0xff] }
  0x42   : > { %848 = vmatpush1.bf16.msra.mxu0 %v847_v19  ;;  %v869_v19 = vpack.c.bf16 %v317_v12, %v313_v11  ;;  %v943_v28 = vpack.c.bf16 %v318_v24, %v314_v23  ;;  %v170_v29 = vld [vmem:[%s1108_s18 + $0x30] sm:$0xff]  ;;  %v172_v35 = vld [vmem:[%s1108_s18 + $0x40] sm:$0xff]  ;;  %v175_v36 = vld [vmem:[%s1108_s18 + $0x58] sm:$0xff] }
  0x43   : > { %920 = vmatpush1.bf16.msra.mxu1 %v919_v20  ;;  %850 = vmatprep.subr.bf16.mxu0 %v849_v21  ;;  %v312_v20 = vld [vmem:[%s1010_s14 + $0x440] sm:$0xff]  ;;  %v174_v30 = vld [vmem:[%s1108_s18 + $0x50] sm:$0xff] }
  0x44   : > { %922 = vmatprep.subr.bf16.mxu1 %v921_v25  ;;  %v316_v21 = vld [vmem:[%s1010_s14 + $0x460] sm:$0xff]  ;;  %v167_v25 = vld [vmem:[%s1108_s18 + $0x18] sm:$0xff] }
  0x45   : > { %v871_v27 = vpack.c.bf16 %v316_v21, %v312_v20 }
  0x46   : > { %852 = vmatpush1.bf16.msra.mxu0 %v851_v31  ;;  %v173_v31 = vld [vmem:[%s1108_s18 + $0x48] sm:$0xff] }
  0x47   : > { %924 = vmatpush1.bf16.msra.mxu1 %v923_v32  ;;  %854 = vmatprep.subr.bf16.mxu0 %v853_v33  ;;  %v980_v32 = vmov 0.0   ;;  %v166_v33 = vld [vmem:[%s1108_s18 + $0x10] sm:$0xff] }
  0x48   : > { %926 = vmatprep.subr.bf16.mxu1 %v925_v37 }
  0x4a   : > { %856 = vmatpush1.bf16.msra.mxu0 %v855_v43 }
  0x4b   : > { %928 = vmatpush1.bf16.msra.mxu1 %v927_v44  ;;  %858 = vmatprep.subr.bf16.mxu0 %v857_v45 }
  0x4c   : > { %930 = vmatprep.subr.bf16.mxu1 %v929_v49 }
  0x4e   : > { %860 = vmatpush1.bf16.msra.mxu0 %v859_v55 }
  0x4f   : > { %932 = vmatpush1.bf16.msra.mxu1 %v931_v56  ;;  %862 = vmatprep.subr.bf16.mxu0 %v861_v57 }
  0x50   : > { %934 = vmatprep.subr.bf16.mxu1 %v933_v61 }
  0x52   : > { %864 = vmatpush1.bf16.msra.mxu0 %v863_v3 }
  0x53   : > { %936 = vmatpush1.bf16.msra.mxu1 %v935_v4  ;;  %866 = vmatprep.subr.bf16.mxu0 %v865_v5 }
  0x54   : > { %938 = vmatprep.subr.bf16.mxu1 %v937_v8 }
  0x55   : > { %398 = vmatmul.mubr.f32.vlgmr.msra.gmra.mrb[0].mxu0 %v164_v13 }
  0x56   : > { %576 = vmatmul.mubr.f32.vlgmr.msra.gmra.mrb[0].mxu1 %v164_v13  ;;  %868 = vmatpush1.bf16.msra.mxu0 %v867_v14 }
  0x57   : > { %940 = vmatpush1.bf16.msra.mxu1 %v939_v17  ;;  %403 = vmatprep.mubr.f32.mxu0 %v168_v18 }
  0x58   : > { %581 = vmatprep.mubr.f32.mxu1 %v168_v18  ;;  %870 = vmatprep.subr.bf16.mxu0 %v869_v19 }
  0x59   : > { %404 = vmatmul.mubr.f32.gmra.mrb[2].mxu0 %v167_v25  ;;  %942 = vmatprep.subr.bf16.mxu1 %v941_v22 }
  0x5a   : > { %582 = vmatmul.mubr.f32.gmra.mrb[2].mxu1 %v167_v25  ;;  %409 = vmatprep.mubr.f32.mxu0 %v171_v26 }
  0x5b   : > { %587 = vmatprep.mubr.f32.mxu1 %v171_v26  ;;  %872 = vmatpush1.bf16.msra.mxu0 %v871_v27 }
  0x5c   : > { %944 = vmatpush1.bf16.msra.mxu1 %v943_v28 }
  0x5d   : > { %410 = vmatmul.mubr.f32.gmra.mrb[4].mxu0 %v170_v29 }
  0x5e   : > { %588 = vmatmul.mubr.f32.gmra.mrb[4].mxu1 %v170_v29  ;;  %415 = vmatprep.mubr.f32.mxu0 %v174_v30 }
  0x5f   : > { %593 = vmatprep.mubr.f32.mxu1 %v174_v30 }
  0x61   : > { %416 = vmatmul.mubr.f32.gmra.mrb[6].mxu0 %v173_v31 }
  0x62   : > { %594 = vmatmul.mubr.f32.gmra.mrb[6].mxu1 %v173_v31  ;;  %486 = vmatprep.mubr.f32.mxu0 %v980_v32 }
  0x63   : > { %664 = vmatprep.mubr.f32.mxu1 %v980_v32 }
  0x65   : > { %782 = vmatmul.mubr.msk.f32.vlgmr.msra.gmra.mrb[0].mxu0 %vm320_vm0, %v166_v33 }
  0x66   : > { %786 = vmatmul.mubr.msk.f32.vlgmr.msra.gmra.mrb[0].mxu1 %vm320_vm0, %v166_v33  ;;  %492 = vmatprep.mubr.f32.mxu0 %v980_v32 }
  0x67   : > { %670 = vmatprep.mubr.f32.mxu1 %v980_v32 }
  0x69   : > { %783 = vmatmul.mubr.msk.f32.gmra.mrb[2].mxu0 %vm320_vm0, %v169_v34 }
  0x6a   : > { %787 = vmatmul.mubr.msk.f32.gmra.mrb[2].mxu1 %vm320_vm0, %v169_v34  ;;  %498 = vmatprep.mubr.f32.mxu0 %v980_v32 }
  0x6b   : > { %676 = vmatprep.mubr.f32.mxu1 %v980_v32 }
  0x6d   : > { %784 = vmatmul.mubr.msk.f32.gmra.mrb[4].mxu0 %vm320_vm0, %v172_v35 }
  0x6e   : > { %788 = vmatmul.mubr.msk.f32.gmra.mrb[4].mxu1 %vm320_vm0, %v172_v35  ;;  %504 = vmatprep.mubr.f32.mxu0 %v980_v32 }
  0x6f   : > { %682 = vmatprep.mubr.f32.mxu1 %v980_v32 }
  0x71   : > { %785 = vmatmul.mubr.msk.f32.gmra.mrb[6].mxu0 %vm320_vm0, %v175_v36 }
  0x72   : > { %789 = vmatmul.mubr.msk.f32.gmra.mrb[6].mxu1 %vm320_vm0, %v175_v36 }
 0x138   : > { %v488_v37 = vpop.f32.mrb[0].mxu0 }
 0x139   : > { %689 = vst [vmem:[%s1186_s22] sm:$0xff] %v488_v37  ;;  %v666_v38 = vpop.f32.mrb[0].mxu1  ;;  %v490_v39 = vpop.f32.mrb[1].mxu0 }
 0x13a   : > { %790 = vst [vmem:[%s1186_s22 + $0x40] sm:$0xff] %v666_v38  ;;  %690 = vst [vmem:[%s1186_s22 + $0x8] sm:$0xff] %v490_v39  ;;  %v668_v40 = vpop.f32.mrb[1].mxu1 }
 0x13b   : > { %791 = vst [vmem:[%s1186_s22 + $0x48] sm:$0xff] %v668_v40 }
 0x13c   : > { %v494_v41 = vpop.f32.mrb[2].mxu0 }
 0x13d   : > { %691 = vst [vmem:[%s1186_s22 + $0x10] sm:$0xff] %v494_v41  ;;  %v672_v42 = vpop.f32.mrb[2].mxu1  ;;  %v496_v43 = vpop.f32.mrb[3].mxu0 }
 0x13e   : > { %792 = vst [vmem:[%s1186_s22 + $0x50] sm:$0xff] %v672_v42  ;;  %692 = vst [vmem:[%s1186_s22 + $0x18] sm:$0xff] %v496_v43  ;;  %v674_v44 = vpop.f32.mrb[3].mxu1 }
 0x13f   : > { %793 = vst [vmem:[%s1186_s22 + $0x58] sm:$0xff] %v674_v44 }
 0x140   : > { %v500_v45 = vpop.f32.mrb[4].mxu0 }
 0x141   : > { %693 = vst [vmem:[%s1186_s22 + $0x20] sm:$0xff] %v500_v45  ;;  %v678_v46 = vpop.f32.mrb[4].mxu1  ;;  %v502_v47 = vpop.f32.mrb[5].mxu0 }
 0x142   : > { %794 = vst [vmem:[%s1186_s22 + $0x60] sm:$0xff] %v678_v46  ;;  %694 = vst [vmem:[%s1186_s22 + $0x28] sm:$0xff] %v502_v47  ;;  %v680_v48 = vpop.f32.mrb[5].mxu1 }
 0x143   : > { %795 = vst [vmem:[%s1186_s22 + $0x68] sm:$0xff] %v680_v48 }
 0x144   : > { %v506_v49 = vpop.f32.mrb[6].mxu0 }
 0x145   : > { %695 = vst [vmem:[%s1186_s22 + $0x30] sm:$0xff] %v506_v49  ;;  %v684_v50 = vpop.f32.mrb[6].mxu1  ;;  %v508_v51 = vpop.f32.mrb[7].mxu0 }
 0x146   : > { %796 = vst [vmem:[%s1186_s22 + $0x70] sm:$0xff] %v684_v50  ;;  %696 = vst [vmem:[%s1186_s22 + $0x38] sm:$0xff] %v508_v51  ;;  %v686_v52 = vpop.f32.mrb[7].mxu1 }
 0x147   : > { %797 = vst [vmem:[%s1186_s22 + $0x78] sm:$0xff] %v686_v52 }
 0x148 PF: > { %s12_s9 = sadd.s32 1, %s978_s9  }
 0x149   : > { %p9_p4 = scmp.ge.s32.totalorder %s12_s9, 4  }
 0x14b   :  { %11 = sbr.rel (!%p9_p4) target bundleno = 1 (0x1), region = 62 }

// kernel: crnn_cell_forward.3
= control target key start
LH: loop header
LB: loop body
LE: loop exit
PB: predicated region body
PF: predicated region fallthrough
CT: control target
= control target key end

     0   :  { %s560_s9 = smov 0   ;;  %s641_s0 = inlined_call_operand.vmem [shape: f32[2,36,512], index: 0, kind: input, shape index: {}]   ;;  %s642_s1 = inlined_call_operand.vmem [shape: f32[2,32,36], index: 1, kind: input, shape index: {}]   ;;  %s643_s2 = inlined_call_operand.vmem [shape: f32[2,2,32,256], index: 2, kind: output, shape index: {}]  }
   0x1 LB: > { %s476_s10 = sadd.s32 4294967295, %s542_s9   ;;  %p480_p0 = scmp.ge.s32.totalorder %s542_s9, 1  ;;  %s542_s9 = sphi %s560_s9, %s12_s9  }
   0x2   : > { %p122_p1 = scmp.lt.s32.totalorder %s542_s9, 3 }
   0x4   : > { %p123_p2 = pnand %p480_p0, %p122_p1 }
   0x5   : > { %p149_p3 = scmp.lt.s32.totalorder (!%p123_p2), %s476_s10, 1  ;;  %v544_v0 = vmov (!%p123_p2), 0.0   ;;  %vm201_vm0 = vcmask (!%p123_p2), 1043456   ;;  %vm188_vm1 = vcmask (!%p123_p2), 293888  }
   0x6   : > { %126 = sbr.rel (%p123_p2) target bundleno = 258 (0x102), region = 28  ;;  %278 = vmatprep.mubr.f32.mxu0 (!%p123_p2), %v544_v0  ;;  %367 = vmatprep.mubr.f32.mxu1 (!%p123_p2), %v544_v0 }
   0xd   : > { %s645_s10 = smov (!%p149_p3, %s476_s10), 1 }
   0xe   : > { %s526_s11 = smul.u32 160, %s645_s10  ;;  %s508_s15 = sshll.u32 %s645_s10, 5 }
   0xf   : > { %s158_s18 = scalar_lea.vmem %s642_s1, %s508_s15  ;;  %s509_s19 = sshll.u32 %s645_s10, 7 }
  0x10   : > { %s576_s14 = scalar_lea.vmem %s641_s0, %s526_s11  ;;  %v164_v29 = vld [vmem:[%s158_s18] sm:$0xff]  ;;  %v165_v30 = vld [vmem:[%s158_s18 + $0x8] sm:$0xff]  ;;  %v166_v31 = vld [vmem:[%s158_s18 + $0x10] sm:$0xff]  ;;  %s620_s22 = scalar_lea.vmem %s643_s2, %s509_s19 }
  0x11   : > { %v169_v1 = vld [vmem:[%s576_s14 + $0x8] sm:$0xff]  ;;  %v171_v3 = vld [vmem:[%s576_s14 + $0x18] sm:$0xff]  ;;  %v168_v6 = vld [vmem:[%s576_s14] sm:$0xff] }
  0x12   : > { %v173_v2 = vld [vmem:[%s576_s14 + $0x28] sm:$0xff]  ;;  %v175_v5 = vld [vmem:[%s576_s14 + $0x38] sm:$0xff]  ;;  %v172_v7 = vld [vmem:[%s576_s14 + $0x20] sm:$0xff] }
  0x13   : > { %v510_v4 = vpack.c.bf16 %v173_v2, %v169_v1  ;;  %v518_v8 = vpack.c.bf16 %v175_v5, %v171_v3  ;;  %v512_v9 = vpack.c.bf16 %v172_v7, %v168_v6  ;;  %v170_v10 = vld [vmem:[%s576_s14 + $0x10] sm:$0xff]  ;;  %v177_v12 = vld [vmem:[%s576_s14 + $0x48] sm:$0xff]  ;;  %v179_v15 = vld [vmem:[%s576_s14 + $0x58] sm:$0xff] }
  0x14   : > { %v174_v11 = vld [vmem:[%s576_s14 + $0x30] sm:$0xff]  ;;  %v181_v14 = vld [vmem:[%s576_s14 + $0x68] sm:$0xff]  ;;  %v183_v16 = vld [vmem:[%s576_s14 + $0x78] sm:$0xff] }
  0x15   : > { %511 = vmatprep.subr.bf16.mxu0 %v510_v4  ;;  %v520_v13 = vpack.c.bf16 %v174_v11, %v170_v10  ;;  %519 = vmatprep.subr.bf16.mxu1 %v518_v8  ;;  %v514_v17 = vpack.c.bf16 %v181_v14, %v177_v12  ;;  %v522_v18 = vpack.c.bf16 %v183_v16, %v179_v15  ;;  %v176_v19 = vld [vmem:[%s576_s14 + $0x40] sm:$0xff]  ;;  %v178_v21 = vld [vmem:[%s576_s14 + $0x50] sm:$0xff]  ;;  %v185_v25 = vld [vmem:[%s576_s14 + $0x88] sm:$0xf] }
  0x16   : > { %513 = vmatpush1.bf16.msra.mxu0 %v512_v9  ;;  %v180_v20 = vld [vmem:[%s576_s14 + $0x60] sm:$0xff]  ;;  %v182_v23 = vld [vmem:[%s576_s14 + $0x70] sm:$0xff]  ;;  %v187_v26 = vld [vmem:[%s576_s14 + $0x98] sm:$0xf] }
  0x17   : > { %521 = vmatpush1.bf16.msra.mxu1 %v520_v13  ;;  %v516_v22 = vpack.c.bf16 %v180_v20, %v176_v19  ;;  %515 = vmatprep.subr.bf16.mxu0 %v514_v17  ;;  %v524_v24 = vpack.c.bf16 %v182_v23, %v178_v21  ;;  %v184_v27 = vld [vmem:[%s576_s14 + $0x80] sm:$0xf]  ;;  %v186_v28 = vld [vmem:[%s576_s14 + $0x90] sm:$0xf]  ;;  %v167_v32 = vld [vmem:[%s158_s18 + $0x18] sm:$0xff] }
  0x18   : > { %523 = vmatprep.subr.bf16.mxu1 %v522_v18 }
  0x1a   : > { %517 = vmatpush1.bf16.msra.mxu0 %v516_v22 }
  0x1b   : > { %525 = vmatpush1.bf16.msra.mxu1 %v524_v24  ;;  %486 = vmatprep.subr.msk.mxu0 %vm201_vm0, %v185_v25 }
  0x1c   : > { %492 = vmatprep.subr.msk.mxu1 %vm201_vm0, %v187_v26 }
  0x1e   : > { %487 = vmatpush1.msk.msra.mxu0 %vm201_vm0, %v184_v27 }
  0x1f   : > { %493 = vmatpush1.msk.msra.mxu1 %vm201_vm0, %v186_v28  ;;  %488 = vmatmul.mubr.msk.f32.vlgmr.msra.gmra.mrb[0].mxu0 %vm188_vm1, %v164_v29 }
  0x20   : > { %494 = vmatmul.mubr.msk.f32.vlgmr.msra.gmra.mrb[0].mxu1 %vm188_vm1, %v164_v29  ;;  %284 = vmatprep.mubr.f32.mxu0 %v544_v0 }
  0x21   : > { %373 = vmatprep.mubr.f32.mxu1 %v544_v0 }
  0x23   : > { %489 = vmatmul.mubr.msk.f32.gmra.mrb[2].mxu0 %vm188_vm1, %v165_v30 }
  0x24   : > { %495 = vmatmul.mubr.msk.f32.gmra.mrb[2].mxu1 %vm188_vm1, %v165_v30  ;;  %290 = vmatprep.mubr.f32.mxu0 %v544_v0 }
  0x25   : > { %379 = vmatprep.mubr.f32.mxu1 %v544_v0 }
  0x27   : > { %490 = vmatmul.mubr.msk.f32.gmra.mrb[4].mxu0 %vm188_vm1, %v166_v31 }
  0x28   : > { %496 = vmatmul.mubr.msk.f32.gmra.mrb[4].mxu1 %vm188_vm1, %v166_v31  ;;  %296 = vmatprep.mubr.f32.mxu0 %v544_v0 }
  0x29   : > { %385 = vmatprep.mubr.f32.mxu1 %v544_v0 }
  0x2b   : > { %491 = vmatmul.mubr.msk.f32.gmra.mrb[6].mxu0 %vm188_vm1, %v167_v32 }
  0x2c   : > { %497 = vmatmul.mubr.msk.f32.gmra.mrb[6].mxu1 %vm188_vm1, %v167_v32 }
  0xf2   : > { %v280_v33 = vpop.f32.mrb[0].mxu0 }
  0xf3   : > { %392 = vst [vmem:[%s620_s22] sm:$0xff] %v280_v33  ;;  %v369_v34 = vpop.f32.mrb[0].mxu1  ;;  %v282_v35 = vpop.f32.mrb[1].mxu0 }
  0xf4   : > { %498 = vst [vmem:[%s620_s22 + $0x40] sm:$0xff] %v369_v34  ;;  %393 = vst [vmem:[%s620_s22 + $0x8] sm:$0xff] %v282_v35  ;;  %v371_v36 = vpop.f32.mrb[1].mxu1 }
  0xf5   : > { %499 = vst [vmem:[%s620_s22 + $0x48] sm:$0xff] %v371_v36 }
  0xf6   : > { %v286_v37 = vpop.f32.mrb[2].mxu0 }
  0xf7   : > { %394 = vst [vmem:[%s620_s22 + $0x10] sm:$0xff] %v286_v37  ;;  %v375_v38 = vpop.f32.mrb[2].mxu1  ;;  %v288_v39 = vpop.f32.mrb[3].mxu0 }
  0xf8   : > { %500 = vst [vmem:[%s620_s22 + $0x50] sm:$0xff] %v375_v38  ;;  %395 = vst [vmem:[%s620_s22 + $0x18] sm:$0xff] %v288_v39  ;;  %v377_v40 = vpop.f32.mrb[3].mxu1 }
  0xf9   : > { %501 = vst [vmem:[%s620_s22 + $0x58] sm:$0xff] %v377_v40 }
  0xfa   : > { %v292_v41 = vpop.f32.mrb[4].mxu0 }
  0xfb   : > { %396 = vst [vmem:[%s620_s22 + $0x20] sm:$0xff] %v292_v41  ;;  %v381_v42 = vpop.f32.mrb[4].mxu1  ;;  %v294_v43 = vpop.f32.mrb[5].mxu0 }
  0xfc   : > { %502 = vst [vmem:[%s620_s22 + $0x60] sm:$0xff] %v381_v42  ;;  %397 = vst [vmem:[%s620_s22 + $0x28] sm:$0xff] %v294_v43  ;;  %v383_v44 = vpop.f32.mrb[5].mxu1 }
  0xfd   : > { %503 = vst [vmem:[%s620_s22 + $0x68] sm:$0xff] %v383_v44 }
  0xfe   : > { %v298_v45 = vpop.f32.mrb[6].mxu0 }
  0xff   : > { %398 = vst [vmem:[%s620_s22 + $0x30] sm:$0xff] %v298_v45  ;;  %v387_v46 = vpop.f32.mrb[6].mxu1  ;;  %v300_v47 = vpop.f32.mrb[7].mxu0 }
 0x100   : > { %504 = vst [vmem:[%s620_s22 + $0x70] sm:$0xff] %v387_v46  ;;  %399 = vst [vmem:[%s620_s22 + $0x38] sm:$0xff] %v300_v47  ;;  %v389_v48 = vpop.f32.mrb[7].mxu1 }
 0x101   : > { %505 = vst [vmem:[%s620_s22 + $0x78] sm:$0xff] %v389_v48 }
 0x102 PF: > { %s12_s9 = sadd.s32 1, %s542_s9  }
 0x103   : > { %p9_p4 = scmp.ge.s32.totalorder %s12_s9, 4  }
 0x105   :  { %11 = sbr.rel (!%p9_p4) target bundleno = 1 (0x1), region = 62 }

// kernel: crnn_cell_forward.5
= control target key start
LH: loop header
LB: loop body
LE: loop exit
PB: predicated region body
PF: predicated region fallthrough
CT: control target
= control target key end

     0   :  { %s1242_s27 = smov 0   ;;  %s1244_s28 = smov 0   ;;  %s1549_s0 = inlined_call_operand.vmem [shape: f32[2,32,256], index: 0, kind: input, shape index: {}]   ;;  %s1550_s1 = inlined_call_operand.vmem [shape: f32[2,32,256], index: 1, kind: input, shape index: {}]   ;;  %s1551_s2 = inlined_call_operand.vmem [shape: f32[2,32,256], index: 2, kind: input, shape index: {}]   ;;  %s1552_s3 = inlined_call_operand.vmem [shape: f32[2,32,256], index: 3, kind: input, shape index: {}]   ;;  %s1553_s4 = inlined_call_operand.vmem [shape: f32[32,1], index: 4, kind: input, shape index: {}]   ;;  %s1554_s5 = inlined_call_operand.vmem [shape: f32[32,1], index: 5, kind: input, shape index: {}]   ;;  %s1555_s6 = inlined_call_operand.vmem [shape: f32[32,1], index: 6, kind: input, shape index: {}]   ;;  %s1556_s7 = inlined_call_operand.vmem [shape: f32[32,1], index: 7, kind: input, shape index: {}]   ;;  %s1557_s8 = inlined_call_operand.vmem [shape: f32[2,32,256], index: 8, kind: output, shape index: {}]  }
   0x1   :  { %s1246_s29 = smov 0  }
   0x2 LB: > { %s30_s30 = sadd.s32 1, %s1190_s28  ;;  %p1111_p0 = scmp.ge.s32.totalorder %s1194_s29, 1  ;;  %s1194_s29 = sphi %s1246_s29, %s18_s29   ;;  %s1190_s28 = sphi %s1244_s28, %s1559_s28   ;;  %s1186_s27 = sphi %s1242_s27, %s1558_s27  }
   0x3   : > { %p32_p1 = scmp.ge.s32.totalorder %s30_s30, 2  ;;  %p382_p2 = scmp.lt.s32.totalorder %s1194_s29, 3 }
   0x5   : > { %s1561_s30 = smov (%p32_p1, %s30_s30), 0  ;;  %p383_p3 = pnand %p1111_p0, %p382_p2 }
   0x6   : > { %p477_p4 = scmp.lt.s32.totalorder (!%p383_p3), %s1186_s27, 1  ;;  %v1196_v0 = vmov (!%p383_p3), 0   ;;  %v580_v57 = vld [vmem:[%s1553_s4 + $0x8] sm:$0xff] (!%p383_p3)  ;;  %v581_v58 = vld [vmem:[%s1553_s4 + $0x10] sm:$0xff] (!%p383_p3)  ;;  %v579_v59 = vld [vmem:[%s1553_s4] sm:$0xff] (!%p383_p3) }
   0x7   : > { %386 = sbr.rel (%p383_p3) target bundleno = 363 (0x16b), region = 52  ;;  %1155 = vset.pattern.permute.xlu1 (!%p383_p3), %v1196_v0  ;;  %1154 = vset.pattern.permute.xlu0 (!%p383_p3), %v1196_v0  ;;  %v732_v60 = vld [vmem:[%s1555_s6] sm:$0xff] (!%p383_p3)  ;;  %v582_v61 = vld [vmem:[%s1553_s4 + $0x18] sm:$0xff] (!%p383_p3)  ;;  %v733_v62 = vld [vmem:[%s1555_s6 + $0x8] sm:$0xff] (!%p383_p3) }
   0x8   : > { %v584_v63 = vld [vmem:[%s1554_s5 + $0x8] sm:$0xff] (!%p383_p3)  ;;  %v734_v0 = vld [vmem:[%s1555_s6 + $0x10] sm:$0xff] (!%p383_p3) }
   0xe   : > { %s1563_s27 = smov (!%p477_p4, %s1186_s27), 1 }
   0xf   : > { %s1260_s9 = sshll.u32 %s1563_s27, 6 }
  0x10   : > { %s485_s12 = scalar_lea.vmem %s1549_s0, %s1260_s9  ;;  %s496_s15 = scalar_lea.vmem %s1550_s1, %s1260_s9 }
  0x11   : > { %v559_v1 = vld [vmem:[%s485_s12 + $0x20] sm:$0xff]  ;;  %v560_v2 = vld [vmem:[%s485_s12 + $0x28] sm:$0xff]  ;;  %v561_v11 = vld [vmem:[%s485_s12 + $0x30] sm:$0xff]  ;;  %s1278_s18 = scalar_lea.vmem %s1551_s2, %s1260_s9  ;;  %s1288_s21 = scalar_lea.vmem %s1552_s3, %s1260_s9 }
  0x12   : > { %v567_v3 = vld [vmem:[%s496_s15 + $0x20] sm:$0xff]  ;;  %v568_v4 = vld [vmem:[%s496_s15 + $0x28] sm:$0xff]  ;;  %v562_v14 = vld [vmem:[%s485_s12 + $0x38] sm:$0xff]  ;;  %s1512_s20 = scalar_lea.vmem %s1557_s8, %s1260_s9 }
  0x13   : > { %v1270_v5 = vadd.f32 %v567_v3, %v559_v1  ;;  %v555_v6 = vld [vmem:[%s485_s12] sm:$0xff]  ;;  %v556_v7 = vld [vmem:[%s485_s12 + $0x8] sm:$0xff]  ;;  %v1272_v8 = vadd.f32 %v568_v4, %v560_v2  ;;  %v569_v15 = vld [vmem:[%s496_s15 + $0x30] sm:$0xff] }
  0x14   : > { %v563_v9 = vld [vmem:[%s496_s15] sm:$0xff]  ;;  %v564_v10 = vld [vmem:[%s496_s15 + $0x8] sm:$0xff]  ;;  %v570_v16 = vld [vmem:[%s496_s15 + $0x38] sm:$0xff]  ;;  %v1292_v18 = vadd.f32 %v569_v15, %v561_v11 }
  0x15   : > { %v1280_v12 = vadd.f32 %v563_v9, %v555_v6  ;;  %v1282_v13 = vadd.f32 %v564_v10, %v556_v7  ;;  %v593_v17 = vadd.f32 %v1272_v8, %v1270_v5  ;;  %v1294_v19 = vadd.f32 %v570_v16, %v562_v14  ;;  %v557_v20 = vld [vmem:[%s485_s12 + $0x10] sm:$0xff]  ;;  %v558_v21 = vld [vmem:[%s485_s12 + $0x18] sm:$0xff]  ;;  %v708_v32 = vld [vmem:[%s1278_s18] sm:$0xff] }
  0x16   : > { %v565_v22 = vld [vmem:[%s496_s15 + $0x10] sm:$0xff]  ;;  %v566_v24 = vld [vmem:[%s496_s15 + $0x18] sm:$0xff]  ;;  %v709_v35 = vld [vmem:[%s1278_s18 + $0x8] sm:$0xff] }
  0x17   : > { %v587_v23 = vadd.f32 %v1282_v13, %v1280_v12  ;;  %v1298_v25 = vadd.f32 %v565_v22, %v557_v20  ;;  %v710_v26 = vld [vmem:[%s1278_s18 + $0x10] sm:$0xff]  ;;  %v711_v27 = vld [vmem:[%s1278_s18 + $0x18] sm:$0xff]  ;;  %594 = vadd.xlane.f32.xlu1 %v593_v17  ;;  %v596_v28 = vadd.f32 %v1294_v19, %v1292_v18  ;;  %v1304_v29 = vadd.f32 %v566_v24, %v558_v21  ;;  %v716_v36 = vld [vmem:[%s1288_s21] sm:$0xff] }
  0x18   : > { %v718_v30 = vld [vmem:[%s1288_s21 + $0x10] sm:$0xff]  ;;  %v719_v31 = vld [vmem:[%s1288_s21 + $0x18] sm:$0xff]  ;;  %v717_v37 = vld [vmem:[%s1288_s21 + $0x8] sm:$0xff]  ;;  %v1318_v39 = vadd.f32 %v716_v36, %v708_v32 }
  0x19   : > { %588 = vadd.xlane.f32.xlu0 %v587_v23  ;;  %v1309_v33 = vadd.f32 %v718_v30, %v710_v26  ;;  %v1311_v34 = vadd.f32 %v719_v31, %v711_v27  ;;  %v590_v38 = vadd.f32 %v1304_v29, %v1298_v25  ;;  %v1320_v40 = vadd.f32 %v717_v37, %v709_v35  ;;  %v712_v41 = vld [vmem:[%s1278_s18 + $0x20] sm:$0xff]  ;;  %v713_v42 = vld [vmem:[%s1278_s18 + $0x28] sm:$0xff]  ;;  %v714_v45 = vld [vmem:[%s1278_s18 + $0x30] sm:$0xff] }
  0x1a   : > { %v720_v43 = vld [vmem:[%s1288_s21 + $0x20] sm:$0xff]  ;;  %v721_v44 = vld [vmem:[%s1288_s21 + $0x28] sm:$0xff]  ;;  %v715_v46 = vld [vmem:[%s1278_s18 + $0x38] sm:$0xff] }
  0x1b   : > { %597 = vadd.xlane.f32.xlu1 %v596_v28  ;;  %v743_v47 = vadd.f32 %v1311_v34, %v1309_v33  ;;  %v1330_v48 = vadd.f32 %v720_v43, %v712_v41  ;;  %v722_v49 = vld [vmem:[%s1288_s21 + $0x30] sm:$0xff]  ;;  %v723_v50 = vld [vmem:[%s1288_s21 + $0x38] sm:$0xff]  ;;  %v740_v51 = vadd.f32 %v1320_v40, %v1318_v39  ;;  %v1336_v52 = vadd.f32 %v721_v44, %v713_v42  ;;  %v737_v3 = vld [vmem:[%s1556_s7 + $0x8] sm:$0xff] }
  0x1c   : > { %v1338_v53 = vadd.f32 %v722_v49, %v714_v45  ;;  %v1340_v54 = vadd.f32 %v723_v50, %v715_v46  ;;  %v586_v1 = vld [vmem:[%s1554_s5 + $0x18] sm:$0xff]  ;;  %v583_v4 = vld [vmem:[%s1554_s5] sm:$0xff]  ;;  %v585_v6 = vld [vmem:[%s1554_s5 + $0x10] sm:$0xff] }
  0x1d   : > { %591 = vadd.xlane.f32.xlu0 %v590_v38  ;;  %v746_v56 = vadd.f32 %v1336_v52, %v1330_v48  ;;  %v735_v2 = vld [vmem:[%s1555_s6 + $0x18] sm:$0xff]  ;;  %v736_v7 = vld [vmem:[%s1556_s7] sm:$0xff] }
  0x1e   : > { %v749_v55 = vadd.f32 %v1340_v54, %v1338_v53 }
  0x1f   : > { %744 = vadd.xlane.f32.xlu1 %v743_v47 }
  0x21   : > { %741 = vadd.xlane.f32.xlu0 %v740_v51 }
  0x23   : > { %750 = vadd.xlane.f32.xlu1 %v749_v55 }
  0x25   : > { %747 = vadd.xlane.f32.xlu0 %v746_v56 }
  0x34   : > { %659 = vperm.xlu1 %1155, %v580_v57  }
  0x38   : > { %664 = vperm.xlu1 %1155, %v581_v58  }
  0x3b   : > { %654 = vperm.xlu0 %1154, %v579_v59  }
  0x3c   : > { %806 = vperm.xlu1 %1155, %v732_v60  }
  0x3f   : > { %669 = vperm.xlu0 %1154, %v582_v61  }
  0x40   : > { %811 = vperm.xlu1 %1155, %v733_v62  }
  0x43   : > { %687 = vperm.xlu0 %1154, %v584_v63   ;;  %v739_v63 = vld [vmem:[%s1556_s7 + $0x18] sm:$0xff] }
  0x44   : > { %816 = vperm.xlu1 %1155, %v734_v0   ;;  %v738_v0 = vld [vmem:[%s1556_s7 + $0x10] sm:$0xff] }
  0x47   : > { %697 = vperm.xlu0 %1154, %v586_v1  }
  0x48   : > { %821 = vperm.xlu1 %1155, %v735_v2  }
  0x4b   : > { %839 = vperm.xlu0 %1154, %v737_v3  }
  0x4c   : > { %682 = vperm.xlu1 %1155, %v583_v4  }
  0x50   : > { %692 = vperm.xlu1 %1155, %v585_v6  }
  0x54   : > { %834 = vperm.xlu1 %1155, %v736_v7  }
  0xa4   : > { %v595_v9 = vpop.xlane.xlu1 %594 }
  0xa5   : > { %v602_v10 = vmul.f32 0.00390625, %v595_v9 }
  0xa6   : > { %v589_v11 = vpop.xlane.xlu0 %588 }
  0xa7   : > { %v600_v14 = vmul.f32 0.00390625, %v589_v11  ;;  %v1389_v15 = vsub.f32 %v1270_v5, %v602_v10  ;;  %v1392_v16 = vsub.f32 %v1272_v8, %v602_v10 }
  0xa8   : > { %v598_v21 = vpop.xlane.xlu1 %597 }
  0xa9   : > { %v1395_v17 = vsub.f32 %v1280_v12, %v600_v14  ;;  %v1398_v20 = vsub.f32 %v1282_v13, %v600_v14  ;;  %v603_v22 = vmul.f32 0.00390625, %v598_v21  ;;  %v616_v24 = vmul.f32 %v1389_v15, %v1389_v15 }
  0xaa   : > { %v592_v23 = vpop.xlane.xlu0 %591  ;;  %v617_v26 = vmul.f32 %v1392_v16, %v1392_v16 }
  0xab   : > { %v601_v5 = vmul.f32 0.00390625, %v592_v23  ;;  %v612_v8 = vmul.f32 %v1395_v17, %v1395_v17  ;;  %v613_v12 = vmul.f32 %v1398_v20, %v1398_v20  ;;  %v1409_v27 = vsub.f32 %v1292_v18, %v603_v22 }
  0xac   : > { %v1412_v13 = vsub.f32 %v1294_v19, %v603_v22  ;;  %v745_v31 = vpop.xlane.xlu1 %744  ;;  %v626_v37 = vadd.f32 %v617_v26, %v616_v24 }
  0xad   : > { %v1415_v28 = vsub.f32 %v1298_v25, %v601_v5  ;;  %v1418_v30 = vsub.f32 %v1304_v29, %v601_v5  ;;  %v620_v32 = vadd.f32 %v613_v12, %v612_v8  ;;  %v753_v35 = vmul.f32 0.00390625, %v745_v31 }
  0xae   : > { %v742_v36 = vpop.xlane.xlu0 %741  ;;  %v618_v38 = vmul.f32 %v1409_v27, %v1409_v27  ;;  %v619_v29 = vmul.f32 %v1412_v13, %v1412_v13 }
  0xaf   : > { %621 = vadd.xlane.f32.xlu0 %v620_v32  ;;  %v752_v18 = vmul.f32 0.00390625, %v742_v36  ;;  %v614_v19 = vmul.f32 %v1415_v28, %v1415_v28  ;;  %v615_v25 = vmul.f32 %v1418_v30, %v1418_v30  ;;  %v1429_v41 = vsub.f32 %v1309_v33, %v753_v35 }
  0xb0   : > { %v1432_v42 = vsub.f32 %v1311_v34, %v753_v35  ;;  %v751_v46 = vpop.xlane.xlu1 %750  ;;  %v629_v51 = vadd.f32 %v619_v29, %v618_v38 }
  0xb1   : > { %v1435_v43 = vsub.f32 %v1318_v39, %v752_v18  ;;  %v1438_v44 = vsub.f32 %v1320_v40, %v752_v18  ;;  %v623_v45 = vadd.f32 %v615_v25, %v614_v19  ;;  %v766_v49 = vmul.f32 %v1429_v41, %v1429_v41 }
  0xb2   : > { %v748_v47 = vpop.xlane.xlu0 %747  ;;  %v767_v50 = vmul.f32 %v1432_v42, %v1432_v42  ;;  %v755_v33 = vmul.f32 0.00390625, %v751_v46 }
  0xb3   : > { %627 = vadd.xlane.f32.xlu0 %v626_v37  ;;  %624 = vadd.xlane.f32.xlu1 %v623_v45  ;;  %v754_v34 = vmul.f32 0.00390625, %v748_v47  ;;  %v764_v39 = vmul.f32 %v1435_v43, %v1435_v43  ;;  %v765_v40 = vmul.f32 %v1438_v44, %v1438_v44 }
  0xb4   : > { %v775_v55 = vadd.f32 %v767_v50, %v766_v49  ;;  %v1455_v58 = vsub.f32 %v1338_v53, %v755_v33  ;;  %v1458_v59 = vsub.f32 %v1340_v54, %v755_v33  ;;  %v660_v1 = vpop.permute.xlu1 %659 }
  0xb5   : > { %v1449_v56 = vsub.f32 %v1330_v48, %v754_v34  ;;  %v1452_v57 = vsub.f32 %v1336_v52, %v754_v34  ;;  %v772_v60 = vadd.f32 %v765_v40, %v764_v39 }
  0xb6   : > { %v770_v52 = vmul.f32 %v1455_v58, %v1455_v58  ;;  %v771_v53 = vmul.f32 %v1458_v59, %v1458_v59 }
  0xb7   : > { %776 = vadd.xlane.f32.xlu0 %v775_v55  ;;  %630 = vadd.xlane.f32.xlu1 %v629_v51  ;;  %v768_v61 = vmul.f32 %v1449_v56, %v1449_v56  ;;  %v769_v62 = vmul.f32 %v1452_v57, %v1452_v57 }
  0xb8   : > { %v781_v54 = vadd.f32 %v771_v53, %v770_v52  ;;  %v1474_v2 = vpop.permute.xlu1 %664 }
  0xb9   : > { %v778_v48 = vadd.f32 %v769_v62, %v768_v61 }
  0xba   : > { %v655_v6 = vpop.permute.xlu0 %654 }
  0xbb   : > { %773 = vadd.xlane.f32.xlu1 %v772_v60 }
  0xbc   : > { %v1476_v3 = vpop.permute.xlu1 %806 }
  0xbe   : > { %v1480_v9 = vpop.permute.xlu0 %669 }
  0xbf   : > { %779 = vadd.xlane.f32.xlu1 %v778_v48 }
  0xc0   : > { %v812_v4 = vpop.permute.xlu1 %811 }
  0xc2   : > { %v688_v11 = vpop.permute.xlu0 %687 }
  0xc3   : > { %782 = vadd.xlane.f32.xlu1 %v781_v54 }
  0xc4   : > { %v1478_v7 = vpop.permute.xlu1 %816 }
  0xc6   : > { %v1486_v21 = vpop.permute.xlu0 %697 }
  0xc8   : > { %v1482_v10 = vpop.permute.xlu1 %821 }
  0xca   : > { %v840_v23 = vpop.permute.xlu0 %839 }
  0xcc   : > { %v1484_v14 = vpop.permute.xlu1 %682 }
  0xcd   : > { %849 = vperm.xlu0 %1154, %v739_v63  }
  0xd0   : > { %v1488_v22 = vpop.permute.xlu1 %692 }
  0xd4   : > { %844 = vperm.xlu1 %1155, %v738_v0   ;;  %v1490_v24 = vpop.permute.xlu1 %834 }
 0x13c   : > { %v622_v26 = vpop.xlane.xlu0 %621 }
 0x13d   : > { %v632_v5 = vmul.f32 0.00390625, %v622_v26 }
 0x13f   : > { %v636_v8 = vadd.f32 1e-05, %v632_v5 }
 0x140   : > { %v625_v12 = vpop.xlane.xlu1 %624  ;;  %v628_v31 = vpop.xlane.xlu0 %627 }
 0x141   : > { %v633_v32 = vmul.f32 0.00390625, %v625_v12  ;;  %v634_v36 = vmul.f32 0.00390625, %v628_v31  ;;  %1156 = vrsqrt.f32 %v636_v8 }
 0x143   : > { %v637_v35 = vadd.f32 1e-05, %v633_v32  ;;  %v638_v25 = vadd.f32 1e-05, %v634_v36 }
 0x144   : > { %v631_v37 = vpop.xlane.xlu1 %630  ;;  %v777_v38 = vpop.xlane.xlu0 %776 }
 0x145   : > { %1158 = vrsqrt.f32 %v637_v35  ;;  %v785_v18 = vmul.f32 0.00390625, %v777_v38  ;;  %v635_v19 = vmul.f32 0.00390625, %v631_v37 }
 0x147   : > { %v789_v29 = vadd.f32 1e-05, %v785_v18  ;;  %v639_v47 = vadd.f32 1e-05, %v635_v19 }
 0x148   : > { %v774_v45 = vpop.xlane.xlu1 %773 }
 0x149   : > { %v784_v46 = vmul.f32 0.00390625, %v774_v45  ;;  %1160 = vrsqrt.f32 %v789_v29 }
 0x14a   : > { %1162 = vrsqrt.f32 %v638_v25 }
 0x14b   : > { %v788_v49 = vadd.f32 1e-05, %v784_v46  ;;  %v1157_v34 = vpop.eup %1156 }
 0x14c   : > { %v780_v50 = vpop.xlane.xlu1 %779  ;;  %v644_v62 = vmul.f32 %v1157_v34, %v1395_v17  ;;  %v645_v48 = vmul.f32 %v1157_v34, %v1398_v20 }
 0x14d   : > { %1164 = vrsqrt.f32 %v788_v49  ;;  %v786_v33 = vmul.f32 0.00390625, %v780_v50 }
 0x14e   : > { %1166 = vrsqrt.f32 %v639_v47  ;;  %v673_v8 = vmul.f32 %v655_v6, %v645_v48 }
 0x14f   : > { %v1159_v51 = vpop.eup %1158  ;;  %v790_v39 = vadd.f32 1e-05, %v786_v33 }
 0x150   : > { %v646_v40 = vmul.f32 %v1159_v51, %v1415_v28  ;;  %v783_v55 = vpop.xlane.xlu1 %782  ;;  %v647_v60 = vmul.f32 %v1159_v51, %v1418_v30  ;;  %v672_v28 = vmul.f32 %v655_v6, %v644_v62  ;;  %v701_v6 = vadd.f32 %v1484_v14, %v673_v8 }
 0x151   : > { %1168 = vrsqrt.f32 %v790_v39  ;;  %v787_v61 = vmul.f32 0.00390625, %v783_v55 }
 0x152   : > { %v674_v54 = vmul.f32 %v660_v1, %v646_v40  ;;  %v675_v0 = vmul.f32 %v660_v1, %v647_v60  ;;  %v700_v38 = vadd.f32 %v1484_v14, %v672_v28 }
 0x153   : > { %v791_v52 = vadd.f32 1e-05, %v787_v61  ;;  %v1161_v53 = vpop.eup %1160  ;;  %v850_v61 = vpop.permute.xlu0 %849 }
 0x154   : > { %v1163_v63 = vpop.eup %1162  ;;  %v798_v26 = vmul.f32 %v1161_v53, %v1429_v41  ;;  %v799_v5 = vmul.f32 %v1161_v53, %v1432_v42  ;;  %v702_v36 = vadd.f32 %v688_v11, %v674_v54  ;;  %v703_v41 = vadd.f32 %v688_v11, %v675_v0  ;;  %v845_v51 = vpop.permute.xlu1 %844 }
 0x155   : > { %1170 = vrsqrt.f32 %v791_v52  ;;  %v648_v35 = vmul.f32 %v1163_v63, %v1389_v15  ;;  %v649_v1 = vmul.f32 %v1163_v63, %v1392_v16 }
 0x156   : > { %v826_v30 = vmul.f32 %v812_v4, %v798_v26  ;;  %v827_v31 = vmul.f32 %v812_v4, %v799_v5 }
 0x157   : > { %v1165_v12 = vpop.eup %1164  ;;  %v677_v29 = vmul.f32 %v1474_v2, %v649_v1 }
 0x158   : > { %v1167_v32 = vpop.eup %1166  ;;  %v796_v17 = vmul.f32 %v1165_v12, %v1435_v43  ;;  %v797_v20 = vmul.f32 %v1165_v12, %v1438_v44  ;;  %v854_v37 = vadd.f32 %v840_v23, %v826_v30  ;;  %v855_v42 = vadd.f32 %v840_v23, %v827_v31 }
 0x159   : > { %v650_v44 = vmul.f32 %v1167_v32, %v1409_v27  ;;  %v651_v19 = vmul.f32 %v1167_v32, %v1412_v13  ;;  %v676_v13 = vmul.f32 %v1474_v2, %v648_v35  ;;  %v705_v40 = vadd.f32 %v1488_v22, %v677_v29 }
 0x15a   : > { %v824_v4 = vmul.f32 %v1476_v3, %v796_v17  ;;  %v825_v18 = vmul.f32 %v1476_v3, %v797_v20  ;;  %v862_v15 = vadd.f32 %v854_v37, %v702_v36  ;;  %v863_v25 = vadd.f32 %v855_v42, %v703_v41 }
 0x15b   : > { %v1169_v43 = vpop.eup %1168  ;;  %v704_v39 = vadd.f32 %v1488_v22, %v676_v13 }
 0x15c   : > { %v852_v16 = vadd.f32 %v1490_v24, %v824_v4  ;;  %v853_v11 = vadd.f32 %v1490_v24, %v825_v18  ;;  %v800_v3 = vmul.f32 %v1169_v43, %v1449_v56  ;;  %v801_v14 = vmul.f32 %v1169_v43, %v1452_v57 }
 0x15d   : > { %v870_v27 = vmax.f32 %v862_v15, 0.0  ;;  %v871_v23 = vmax.f32 %v863_v25, 0.0  ;;  %v678_v24 = vmul.f32 %v1480_v9, %v650_v44  ;;  %v679_v56 = vmul.f32 %v1480_v9, %v651_v19 }
 0x15e   : > { %v860_v45 = vadd.f32 %v852_v16, %v700_v38  ;;  %v861_v46 = vadd.f32 %v853_v11, %v701_v6  ;;  %v828_v47 = vmul.f32 %v1478_v7, %v800_v3  ;;  %v829_v49 = vmul.f32 %v1478_v7, %v801_v14 }
 0x15f   : > { %v1171_v50 = vpop.eup %1170  ;;  %878 = vst [vmem:[%s1512_s20 + $0x10] sm:$0xff] %v870_v27  ;;  %879 = vst [vmem:[%s1512_s20 + $0x18] sm:$0xff] %v871_v23  ;;  %v706_v62 = vadd.f32 %v1486_v21, %v678_v24  ;;  %v707_v48 = vadd.f32 %v1486_v21, %v679_v56 }
 0x160   : > { %v868_v57 = vmax.f32 %v860_v45, 0.0  ;;  %v869_v33 = vmax.f32 %v861_v46, 0.0  ;;  %v802_v34 = vmul.f32 %v1171_v50, %v1455_v58  ;;  %v803_v2 = vmul.f32 %v1171_v50, %v1458_v59 }
 0x161   : > { %v856_v7 = vadd.f32 %v845_v51, %v828_v47  ;;  %v857_v55 = vadd.f32 %v845_v51, %v829_v49 }
 0x162   : > { %876 = vst [vmem:[%s1512_s20] sm:$0xff] %v868_v57  ;;  %877 = vst [vmem:[%s1512_s20 + $0x8] sm:$0xff] %v869_v33  ;;  %v830_v9 = vmul.f32 %v1482_v10, %v802_v34  ;;  %v831_v60 = vmul.f32 %v1482_v10, %v803_v2 }
 0x163   : > { %v864_v58 = vadd.f32 %v856_v7, %v704_v39  ;;  %v865_v59 = vadd.f32 %v857_v55, %v705_v40 }
 0x164   : > { %v858_v22 = vadd.f32 %v850_v61, %v830_v9  ;;  %v859_v52 = vadd.f32 %v850_v61, %v831_v60 }
 0x165   : > { %v872_v53 = vmax.f32 %v864_v58, 0.0  ;;  %v873_v54 = vmax.f32 %v865_v59, 0.0 }
 0x166   : > { %v866_v63 = vadd.f32 %v858_v22, %v706_v62  ;;  %v867_v0 = vadd.f32 %v859_v52, %v707_v48 }
 0x167   : > { %880 = vst [vmem:[%s1512_s20 + $0x20] sm:$0xff] %v872_v53  ;;  %881 = vst [vmem:[%s1512_s20 + $0x28] sm:$0xff] %v873_v54 }
 0x168   : > { %v874_v26 = vmax.f32 %v866_v63, 0.0  ;;  %v875_v5 = vmax.f32 %v867_v0, 0.0 }
 0x16a   : > { %882 = vst [vmem:[%s1512_s20 + $0x30] sm:$0xff] %v874_v26  ;;  %883 = vst [vmem:[%s1512_s20 + $0x38] sm:$0xff] %v875_v5 }
 0x16b PF: > { %s18_s29 = sadd.s32 1, %s1194_s29   ;;  %s1558_s27 = smov %s1190_s28 }
 0x16c   : > { %p15_p5 = scmp.ge.s32.totalorder %s18_s29, 4   ;;  %s1559_s28 = smov %s1561_s30 }
 0x16e   :  { %17 = sbr.rel (!%p15_p5) target bundleno = 2 (0x2), region = 103 }

</bundles_post_ra>
